<compile_context>
chip_gen: v7x
topology: tpu7x:2x2x1
jax: 0.10.0
libtpu: 0.0.40
codegen_flags: <defaults>
</compile_context>

<pallas_src>
import functools

import jax
import jax.numpy as jnp
from jax import lax
from jax.experimental import pallas as pl
from jax.experimental.pallas import tpu as pltpu


# ----------------------------- Pallas kernels ------------------------------ #

def _conv3x3_kernel(*refs, H, W, apply_preact, pad_out):
    """3x3 conv (pad=1) on one image in flat-halo layout, single K=9*Cin matmul.

    Inputs (in order):
      x_ref:     (1, Cin, L)    flat-halo activations; pad contents are irrelevant
                                (every tap is masked), only slice bounds matter.
      w_ref:     (Cout, 9*Cin)  bf16 weights, tap-major: [:, (ky*3+kx)*Cin + cin].
      mask_ref:  (9, 1, H*W)    f32 tap-validity masks (1.0 inside the image).
      scale_ref: (Cin, 1)       [only if apply_preact] folded BN scale (prev layer)
      shift_ref: (Cin, 1)       [only if apply_preact] folded BN shift (prev layer)
    Outputs:
      y_ref:     (1, Cout, L) if pad_out else (1, Cout, H*W)  raw conv output
                                (flat-halo layout when pad_out), lane-dense.
      stats_ref: (1, Cout, 2)   per-image [sum, M2] per channel (f32).
    """
    if apply_preact:
        x_ref, w_ref, mask_ref, scale_ref, shift_ref, y_ref, stats_ref = refs
    else:
        x_ref, w_ref, mask_ref, y_ref, stats_ref = refs

    HW = H * W
    Cout = w_ref.shape[0]

    x = x_ref[0].astype(jnp.float32)                      # (Cin, L)
    if apply_preact:
        # Previous layer's BN + ReLU fused into the tap read.  Padding positions
        # turn into max(shift, 0), but every tap is masked below, so no border
        # re-zeroing is required.
        x = jnp.maximum(x * scale_ref[...] + shift_ref[...], 0.0)

    # 9 taps = contiguous lane slices of the flat-halo tile (no reshapes), each
    # multiplied by its validity mask, stacked into one (9*Cin, HW) col matrix.
    taps = []
    for k in range(9):                                    # static unroll over taps
        ky, kx = k // 3, k % 3
        start = ky * W + kx
        taps.append(x[:, start:start + HW] * mask_ref[k])
    col = jnp.concatenate(taps, axis=0).astype(jnp.bfloat16)       # (9*Cin, HW)

    # One MXU matmul with K = 9*Cin; H*W lands on the lane axis of the result.
    acc = jnp.dot(w_ref[...], col, preferred_element_type=jnp.float32)  # (Cout, HW)

    # Per-image BN partial statistics: channel sum and M2 (sum of squared
    # deviations from the per-image mean); combined exactly across images in JAX.
    s = jnp.sum(acc, axis=1, keepdims=True)               # (Cout, 1)
    mu = s * (1.0 / HW)
    d = acc - mu
    m2 = jnp.sum(d * d, axis=1, keepdims=True)            # (Cout, 1)
    stats_ref[0] = jnp.concatenate([s, m2], axis=1)       # (Cout, 2)

    if pad_out:
        # Emit directly in the flat-halo layout so the next conv needs no pad pass.
        L = y_ref.shape[2]
        lpad = W + 1
        out = jnp.concatenate(
            [jnp.zeros((Cout, lpad), jnp.float32), acc,
             jnp.zeros((Cout, L - lpad - HW), jnp.float32)], axis=1)
        y_ref[0] = out.astype(y_ref.dtype)
    else:
        y_ref[0] = acc.astype(y_ref.dtype)


def _bn_relu_kernel(x_ref, scale_ref, shift_ref, o_ref):
    # x_ref: (1, C, HW)   scale_ref/shift_ref: (C, 1)   o_ref: (1, C, HW)
    y = x_ref[0].astype(jnp.float32) * scale_ref[...] + shift_ref[...]
    o_ref[0] = jnp.maximum(y, 0.0).astype(o_ref.dtype)


# ------------------------------ VMEM sizing -------------------------------- #

def _tile_padded_bytes(shape, dtype):
    """VMEM footprint of one block with the two minor dims padded to the native
    (sublane, lane) tile (sub-32-bit dtypes pack extra rows into the sublane)."""
    itemsize = jnp.dtype(dtype).itemsize
    sublane = 8 * max(1, 4 // itemsize)
    dims = list(shape) if len(shape) >= 2 else [1] + list(shape)
    dims[-1] = -(-int(dims[-1]) // 128) * 128
    dims[-2] = -(-int(dims[-2]) // sublane) * sublane
    n = 1
    for d in dims:
        n *= int(d)
    return n * itemsize


def _vmem_limit_bytes(blocks):
    """Scoped-VMEM limit from double-buffered, tile-padded block sizes, capped at
    ~80% of the chip's physical VMEM (128 MiB on v5e/v6e, 64 MiB per TC on v7x)."""
    need = sum(2 * _tile_padded_bytes(s, d) for s, d in blocks)   # double-buffered
    need = 2 * need + (8 << 20)          # in-kernel temporaries / relayout headroom
    try:
        cap = int(getattr(pltpu.get_tpu_info(), "vmem_capacity_bytes", 0)) or (64 << 20)
    except Exception:
        cap = 64 << 20
    return int(min(int(cap * 0.8), max(32 << 20, need)))


# ------------------------------ JAX wrappers ------------------------------- #

def conv3x3_bn_stats(x_flat, w_mat, tap_mask, *, H, W, pre_scale=None,
                     pre_shift=None, out_dtype=jnp.float32, pad_out=False):
    """3x3 conv, pad=1, stride=1, no bias, over flat-halo activations.

    x_flat:   (N, Cin, L)   flat-halo layout (L = lane-rounded (H+2)*W + 2)
    w_mat:    (Cout, 9*Cin) bf16 tap-major weights
    tap_mask: (9, 1, H*W)   f32 validity masks
    Returns (y, stats): y is (N, Cout, L) [pad_out] or (N, Cout, H*W);
    stats is (N, Cout, 2) per-image [sum, M2] per channel.
    """
    N, Cin, L = x_flat.shape
    Cout = w_mat.shape[0]
    HW = H * W
    Lout = L if pad_out else HW
    apply_preact = pre_scale is not None

    kernel = functools.partial(_conv3x3_kernel, H=H, W=W,
                               apply_preact=apply_preact, pad_out=pad_out)

    in_specs = [
        pl.BlockSpec((1, Cin, L), lambda i: (i, 0, 0)),
        pl.BlockSpec((Cout, 9 * Cin), lambda i: (0, 0)),      # fetched once
        pl.BlockSpec((9, 1, HW), lambda i: (0, 0, 0)),        # fetched once
    ]
    args = [x_flat, w_mat, tap_mask]
    blocks = [((1, Cin, L), x_flat.dtype), ((Cout, 9 * Cin), w_mat.dtype),
              ((9, 1, HW), tap_mask.dtype),
              ((1, Cout, Lout), out_dtype), ((1, Cout, 2), jnp.float32)]
    if apply_preact:
        in_specs += [pl.BlockSpec((Cin, 1), lambda i: (0, 0)),
                     pl.BlockSpec((Cin, 1), lambda i: (0, 0))]
        args += [pre_scale.reshape(Cin, 1).astype(jnp.float32),
                 pre_shift.reshape(Cin, 1).astype(jnp.float32)]
        blocks += [((Cin, 1), jnp.float32), ((Cin, 1), jnp.float32)]

    return pl.pallas_call(
        kernel,
        out_shape=(jax.ShapeDtypeStruct((N, Cout, Lout), out_dtype),
                   jax.ShapeDtypeStruct((N, Cout, 2), jnp.float32)),
        grid_spec=pltpu.PrefetchScalarGridSpec(
            num_scalar_prefetch=0,
            grid=(N,),                                        # one image per step
            in_specs=in_specs,
            out_specs=(pl.BlockSpec((1, Cout, Lout), lambda i: (i, 0, 0)),
                       pl.BlockSpec((1, Cout, 2), lambda i: (i, 0, 0)))),
        compiler_params=pltpu.CompilerParams(
            dimension_semantics=("parallel",),
            vmem_limit_bytes=_vmem_limit_bytes(blocks)),
    )(*args)


def batchnorm_relu(y, scale, shift):
    """Folded BN + ReLU over (N, C, H*W) activations, lane-dense blocks."""
    N, C, HW = y.shape
    blocks = [((1, C, HW), y.dtype), ((C, 1), jnp.float32), ((C, 1), jnp.float32),
              ((1, C, HW), jnp.float32)]
    return pl.pallas_call(
        _bn_relu_kernel,
        out_shape=jax.ShapeDtypeStruct((N, C, HW), jnp.float32),
        grid_spec=pltpu.PrefetchScalarGridSpec(
            num_scalar_prefetch=0,
            grid=(N,),
            in_specs=[pl.BlockSpec((1, C, HW), lambda i: (i, 0, 0)),
                      pl.BlockSpec((C, 1), lambda i: (0, 0)),
                      pl.BlockSpec((C, 1), lambda i: (0, 0))],
            out_specs=pl.BlockSpec((1, C, HW), lambda i: (i, 0, 0))),
        compiler_params=pltpu.CompilerParams(
            dimension_semantics=("parallel",),
            vmem_limit_bytes=_vmem_limit_bytes(blocks)),
    )(y, scale.reshape(C, 1).astype(jnp.float32),
      shift.reshape(C, 1).astype(jnp.float32))


def _fold_bn(stats, count_per_image, gamma, beta, eps=1e-5):
    """Combine per-image (sum, M2) partials exactly (grouped-variance formula) and
    fold into per-channel scale/shift.  PyTorch training-mode BN: biased var."""
    n_img = stats.shape[0]
    n_i = jnp.float32(count_per_image)
    total_n = n_i * n_img
    sums = stats[:, :, 0]                                  # (N, C)
    m2s = stats[:, :, 1]                                   # (N, C)
    means = sums / n_i
    mean = jnp.sum(sums, axis=0) / total_n                 # (C,)
    m2 = jnp.sum(m2s, axis=0) + n_i * jnp.sum((means - mean[None, :]) ** 2, axis=0)
    var = jnp.maximum(m2 / total_n, 0.0)
    scale = gamma * lax.rsqrt(var + eps)
    shift = beta - mean * scale
    return scale, shift


def double_conv_forward(x_nchw, params, eps=1e-5):
    """Equivalent of DoubleConv.forward on an NCHW input (NCHW returned)."""
    N, Cin, H, W = x_nchw.shape
    HW = H * W
    # Flat-halo length: 1 + (H+2)*W + 1, rounded up to a lane multiple so every
    # activation block is lane-aligned (unmasked vst / dense DMA).
    L = -(-((H + 2) * W + 2) // 128) * 128

    def to_flat_halo(a):                                   # (N, C, H, W) -> (N, C, L)
        a = jnp.pad(a, ((0, 0), (0, 0), (1, 1), (0, 0)))   # halo rows (top/bottom)
        a = a.reshape(N, a.shape[1], (H + 2) * W)
        return jnp.pad(a, ((0, 0), (0, 0), (1, L - (H + 2) * W - 1)))

    def to_tap_major(w):                                   # OIHW -> (O, 9*I) bf16
        o, i = w.shape[0], w.shape[1]
        return jnp.transpose(w, (0, 2, 3, 1)).reshape(o, 9 * i).astype(jnp.bfloat16)

    # (9, 1, HW) tap-validity masks: tap (ky, kx) contributes to output pixel
    # (r, c) iff (r+ky-1, c+kx-1) lies inside the image.
    idx = jnp.arange(HW, dtype=jnp.int32)
    r, c = idx // W, idx % W
    tap_mask = jnp.stack([
        ((r + ky - 1 >= 0) & (r + ky - 1 < H) & (c + kx - 1 >= 0) & (c + kx - 1 < W))
        for ky in range(3) for kx in range(3)
    ]).astype(jnp.float32).reshape(9, 1, HW)

    xp = to_flat_halo(x_nchw)

    # conv1: raw conv output written straight into flat-halo bf16 (+ BN1 stats).
    y1p, st1 = conv3x3_bn_stats(xp, to_tap_major(params["w1"]), tap_mask,
                                H=H, W=W, out_dtype=jnp.bfloat16, pad_out=True)
    scale1, shift1 = _fold_bn(st1, HW, params["g1"], params["b1"], eps)

    # conv2: BN1 + ReLU fused into its input read (+ BN2 stats).
    y2, st2 = conv3x3_bn_stats(y1p, to_tap_major(params["w2"]), tap_mask,
                               H=H, W=W, pre_scale=scale1, pre_shift=shift1,
                               out_dtype=jnp.float32, pad_out=False)
    scale2, shift2 = _fold_bn(st2, HW, params["g2"], params["b2"], eps)

    out = batchnorm_relu(y2, scale2, shift2)               # (N, Cout, HW), f32
    return out.reshape(x_nchw.shape[0], params["w2"].shape[0], H, W)   # NCHW


# ------------------------- deterministic parameters ------------------------ #

def init_params(key, in_channels, out_channels, mid_channels=None):
    if not mid_channels:
        mid_channels = out_channels
    k1, k2, k3, k4, k5, k6 = jax.random.split(key, 6)
    w1 = jax.random.normal(k1, (mid_channels, in_channels, 3, 3), jnp.float32)
    w1 = w1 * jnp.sqrt(2.0 / (in_channels * 9))
    w2 = jax.random.normal(k2, (out_channels, mid_channels, 3, 3), jnp.float32)
    w2 = w2 * jnp.sqrt(2.0 / (mid_channels * 9))
    g1 = 1.0 + 0.1 * jax.random.normal(k3, (mid_channels,), jnp.float32)
    b1 = 0.1 * jax.random.normal(k4, (mid_channels,), jnp.float32)
    g2 = 1.0 + 0.1 * jax.random.normal(k5, (out_channels,), jnp.float32)
    b2 = 0.1 * jax.random.normal(k6, (out_channels,), jnp.float32)
    return dict(w1=w1, g1=g1, b1=b1, w2=w2, g2=g2, b2=b2)


# ------------------------------ pure-JAX reference -------------------------- #

def reference_forward(x_nchw, params, eps=1e-5):
    def conv(x, w):
        return lax.conv_general_dilated(
            x, w, window_strides=(1, 1), padding="SAME",
            dimension_numbers=("NCHW", "OIHW", "NCHW"))

    def bn_relu(y, g, b):
        mean = y.mean(axis=(0, 2, 3), keepdims=True)
        var = ((y - mean) ** 2).mean(axis=(0, 2, 3), keepdims=True)
        yn = (y - mean) * lax.rsqrt(var + eps)
        yn = yn * g[None, :, None, None] + b[None, :, None, None]
        return jnp.maximum(yn, 0.0)

    y = bn_relu(conv(x_nchw, params["w1"]), params["g1"], params["b1"])
    y = bn_relu(conv(y, params["w2"]), params["g2"], params["b2"])
    return y


# ---------------------------------- main ----------------------------------- #

if __name__ == "__main__":
    key = jax.random.PRNGKey(0)
    kx, kp = jax.random.split(key)

    N, Cin, H, W = 2, 4, 16, 16
    Cout = 8  # mid_channels defaults to out_channels

    x = jax.random.normal(kx, (N, Cin, H, W), jnp.float32)
    params = init_params(kp, Cin, Cout)

    fwd = jax.jit(double_conv_forward)
    out = jax.block_until_ready(fwd(x, params))

    ref = reference_forward(x, params)
    assert out.shape == (N, Cout, H, W)
    err = jnp.abs(out - ref)
    max_err = float(jnp.max(err))
    mean_err = float(jnp.mean(err))
    # bf16 MXU inputs + bf16 mid activation => small absolute deviation vs the
    # all-f32 reference is expected and intentional.
    assert max_err < 1e-1 and mean_err < 1e-2, (max_err, mean_err)
    print("KERNEL_OK")
</pallas_src>

<mosaic_0001>
module attributes {stable_mosaic.version = 11 : i64} {
  func.func @_conv3x3_kernel(%arg0: i32, %arg1: memref<1x4x384xf32, #tpu.memory_space<vmem>>, %arg2: memref<8x36xbf16, #tpu.memory_space<vmem>>, %arg3: memref<9x1x256xf32, #tpu.memory_space<vmem>>, %arg4: memref<1x8x384xbf16, #tpu.memory_space<vmem>>, %arg5: memref<1x8x2xf32, #tpu.memory_space<vmem>>) attributes {dimension_semantics = [#tpu.dimension_semantics<parallel>], iteration_bounds = array<i64: 2>, scalar_prefetch = 0 : i64, scratch_operands = 0 : i64, tpu.core_type = #tpu.core_type<tc>, window_params = [{transform_indices = @transform_0, window_bounds = array<i64: 1, 4, 384>}, {pipeline_mode = #tpu.pipeline_mode<synchronous>, transform_indices = @transform_1, window_bounds = array<i64: 8, 36>}, {pipeline_mode = #tpu.pipeline_mode<synchronous>, transform_indices = @transform_2, window_bounds = array<i64: 9, 1, 256>}, {transform_indices = @transform_3, window_bounds = array<i64: 1, 8, 384>}, {transform_indices = @transform_4, window_bounds = array<i64: 1, 8, 2>}]} {
    %c0 = arith.constant 0 : index
    %c0_0 = arith.constant 0 : index
    %c0_1 = arith.constant 0 : index
    %0 = vector.load %arg1[%c0, %c0_0, %c0_1] : memref<1x4x384xf32, #tpu.memory_space<vmem>>, vector<1x4x384xf32>
    %1 = vector.shape_cast %0 : vector<1x4x384xf32> to vector<4x384xf32>
    %2 = vector.extract_strided_slice %1 {offsets = [0, 0], sizes = [4, 256], strides = [1, 1]} : vector<4x384xf32> to vector<4x256xf32>
    %c0_2 = arith.constant 0 : index
    %c0_3 = arith.constant 0 : index
    %c0_4 = arith.constant 0 : index
    %3 = vector.load %arg3[%c0_2, %c0_3, %c0_4] : memref<9x1x256xf32, #tpu.memory_space<vmem>>, vector<1x1x256xf32>
    %4 = vector.shape_cast %3 : vector<1x1x256xf32> to vector<1x256xf32>
    %5 = vector.broadcast %4 : vector<1x256xf32> to vector<4x256xf32>
    %6 = arith.mulf %2, %5 : vector<4x256xf32>
    %7 = vector.extract_strided_slice %1 {offsets = [0, 1], sizes = [4, 256], strides = [1, 1]} : vector<4x384xf32> to vector<4x256xf32>
    %c1 = arith.constant 1 : index
    %c0_5 = arith.constant 0 : index
    %c0_6 = arith.constant 0 : index
    %8 = vector.load %arg3[%c1, %c0_5, %c0_6] : memref<9x1x256xf32, #tpu.memory_space<vmem>>, vector<1x1x256xf32>
    %9 = vector.shape_cast %8 : vector<1x1x256xf32> to vector<1x256xf32>
    %10 = vector.broadcast %9 : vector<1x256xf32> to vector<4x256xf32>
    %11 = arith.mulf %7, %10 : vector<4x256xf32>
    %12 = vector.extract_strided_slice %1 {offsets = [0, 2], sizes = [4, 256], strides = [1, 1]} : vector<4x384xf32> to vector<4x256xf32>
    %c2 = arith.constant 2 : index
    %c0_7 = arith.constant 0 : index
    %c0_8 = arith.constant 0 : index
    %13 = vector.load %arg3[%c2, %c0_7, %c0_8] : memref<9x1x256xf32, #tpu.memory_space<vmem>>, vector<1x1x256xf32>
    %14 = vector.shape_cast %13 : vector<1x1x256xf32> to vector<1x256xf32>
    %15 = vector.broadcast %14 : vector<1x256xf32> to vector<4x256xf32>
    %16 = arith.mulf %12, %15 : vector<4x256xf32>
    %17 = vector.extract_strided_slice %1 {offsets = [0, 16], sizes = [4, 256], strides = [1, 1]} : vector<4x384xf32> to vector<4x256xf32>
    %c3 = arith.constant 3 : index
    %c0_9 = arith.constant 0 : index
    %c0_10 = arith.constant 0 : index
    %18 = vector.load %arg3[%c3, %c0_9, %c0_10] : memref<9x1x256xf32, #tpu.memory_space<vmem>>, vector<1x1x256xf32>
    %19 = vector.shape_cast %18 : vector<1x1x256xf32> to vector<1x256xf32>
    %20 = vector.broadcast %19 : vector<1x256xf32> to vector<4x256xf32>
    %21 = arith.mulf %17, %20 : vector<4x256xf32>
    %22 = vector.extract_strided_slice %1 {offsets = [0, 17], sizes = [4, 256], strides = [1, 1]} : vector<4x384xf32> to vector<4x256xf32>
    %c4 = arith.constant 4 : index
    %c0_11 = arith.constant 0 : index
    %c0_12 = arith.constant 0 : index
    %23 = vector.load %arg3[%c4, %c0_11, %c0_12] : memref<9x1x256xf32, #tpu.memory_space<vmem>>, vector<1x1x256xf32>
    %24 = vector.shape_cast %23 : vector<1x1x256xf32> to vector<1x256xf32>
    %25 = vector.broadcast %24 : vector<1x256xf32> to vector<4x256xf32>
    %26 = arith.mulf %22, %25 : vector<4x256xf32>
    %27 = vector.extract_strided_slice %1 {offsets = [0, 18], sizes = [4, 256], strides = [1, 1]} : vector<4x384xf32> to vector<4x256xf32>
    %c5 = arith.constant 5 : index
    %c0_13 = arith.constant 0 : index
    %c0_14 = arith.constant 0 : index
    %28 = vector.load %arg3[%c5, %c0_13, %c0_14] : memref<9x1x256xf32, #tpu.memory_space<vmem>>, vector<1x1x256xf32>
    %29 = vector.shape_cast %28 : vector<1x1x256xf32> to vector<1x256xf32>
    %30 = vector.broadcast %29 : vector<1x256xf32> to vector<4x256xf32>
    %31 = arith.mulf %27, %30 : vector<4x256xf32>
    %32 = vector.extract_strided_slice %1 {offsets = [0, 32], sizes = [4, 256], strides = [1, 1]} : vector<4x384xf32> to vector<4x256xf32>
    %c6 = arith.constant 6 : index
    %c0_15 = arith.constant 0 : index
    %c0_16 = arith.constant 0 : index
    %33 = vector.load %arg3[%c6, %c0_15, %c0_16] : memref<9x1x256xf32, #tpu.memory_space<vmem>>, vector<1x1x256xf32>
    %34 = vector.shape_cast %33 : vector<1x1x256xf32> to vector<1x256xf32>
    %35 = vector.broadcast %34 : vector<1x256xf32> to vector<4x256xf32>
    %36 = arith.mulf %32, %35 : vector<4x256xf32>
    %37 = vector.extract_strided_slice %1 {offsets = [0, 33], sizes = [4, 256], strides = [1, 1]} : vector<4x384xf32> to vector<4x256xf32>
    %c7 = arith.constant 7 : index
    %c0_17 = arith.constant 0 : index
    %c0_18 = arith.constant 0 : index
    %38 = vector.load %arg3[%c7, %c0_17, %c0_18] : memref<9x1x256xf32, #tpu.memory_space<vmem>>, vector<1x1x256xf32>
    %39 = vector.shape_cast %38 : vector<1x1x256xf32> to vector<1x256xf32>
    %40 = vector.broadcast %39 : vector<1x256xf32> to vector<4x256xf32>
    %41 = arith.mulf %37, %40 : vector<4x256xf32>
    %42 = vector.extract_strided_slice %1 {offsets = [0, 34], sizes = [4, 256], strides = [1, 1]} : vector<4x384xf32> to vector<4x256xf32>
    %c8 = arith.constant 8 : index
    %c0_19 = arith.constant 0 : index
    %c0_20 = arith.constant 0 : index
    %43 = vector.load %arg3[%c8, %c0_19, %c0_20] : memref<9x1x256xf32, #tpu.memory_space<vmem>>, vector<1x1x256xf32>
    %44 = vector.shape_cast %43 : vector<1x1x256xf32> to vector<1x256xf32>
    %45 = vector.broadcast %44 : vector<1x256xf32> to vector<4x256xf32>
    %46 = arith.mulf %42, %45 : vector<4x256xf32>
    %47 = tpu.concatenate %6, %11, %16, %21, %26, %31, %36, %41, %46 in 0 : vector<4x256xf32>, vector<4x256xf32>, vector<4x256xf32>, vector<4x256xf32>, vector<4x256xf32>, vector<4x256xf32>, vector<4x256xf32>, vector<4x256xf32>, vector<4x256xf32> -> vector<36x256xf32>
    %48 = arith.truncf %47 : vector<36x256xf32> to vector<36x256xbf16>
    %c0_21 = arith.constant 0 : index
    %c0_22 = arith.constant 0 : index
    %49 = vector.load %arg2[%c0_21, %c0_22] : memref<8x36xbf16, #tpu.memory_space<vmem>>, vector<8x36xbf16>
    %cst = arith.constant dense<0.000000e+00> : vector<8x256xf32>
    %50 = tpu.matmul %49, %48, %cst {dimension_numbers = #tpu.dot_dimension_numbers<[1], [0], [0], [1], [0, 0, 1, 1], [], []>} : vector<8x36xbf16>, vector<36x256xbf16>, vector<8x256xf32> -> vector<8x256xf32>
    %cst_23 = arith.constant dense<0.000000e+00> : vector<8xf32>
    %51 = vector.multi_reduction <add>, %50, %cst_23 [1] : vector<8x256xf32> to vector<8xf32>
    %52 = vector.shape_cast %51 : vector<8xf32> to vector<8x1xf32>
    %cst_24 = arith.constant 3.906250e-03 : f32
    %53 = vector.broadcast %cst_24 : f32 to vector<8x1xf32>
    %54 = arith.mulf %52, %53 : vector<8x1xf32>
    %55 = vector.broadcast %54 : vector<8x1xf32> to vector<8x256xf32>
    %56 = arith.subf %50, %55 : vector<8x256xf32>
    %57 = arith.mulf %56, %56 : vector<8x256xf32>
    %cst_25 = arith.constant dense<0.000000e+00> : vector<8xf32>
    %58 = vector.multi_reduction <add>, %57, %cst_25 [1] : vector<8x256xf32> to vector<8xf32>
    %59 = vector.shape_cast %58 : vector<8xf32> to vector<8x1xf32>
    %60 = tpu.concatenate %52, %59 in 1 : vector<8x1xf32>, vector<8x1xf32> -> vector<8x2xf32>
    %c0_26 = arith.constant 0 : index
    %c0_27 = arith.constant 0 : index
    %c0_28 = arith.constant 0 : index
    %61 = vector.load %arg5[%c0_26, %c0_27, %c0_28] : memref<1x8x2xf32, #tpu.memory_space<vmem>>, vector<1x8x2xf32>
    %62 = vector.shape_cast %61 : vector<1x8x2xf32> to vector<8x2xf32>
    %63 = vector.shape_cast %60 : vector<8x2xf32> to vector<1x8x2xf32>
    tpu.vector_store %arg5[%c0_26, %c0_27, %c0_28], %63 {strides = array<i32>} : memref<1x8x2xf32, #tpu.memory_space<vmem>>, vector<1x8x2xf32>,
    %cst_29 = arith.constant 0.000000e+00 : f32
    %64 = vector.broadcast %cst_29 : f32 to vector<8x17xf32>
    %cst_30 = arith.constant 0.000000e+00 : f32
    %65 = vector.broadcast %cst_30 : f32 to vector<8x111xf32>
    %66 = tpu.concatenate %64, %50, %65 in 1 : vector<8x17xf32>, vector<8x256xf32>, vector<8x111xf32> -> vector<8x384xf32>
    %67 = arith.truncf %66 : vector<8x384xf32> to vector<8x384xbf16>
    %c0_31 = arith.constant 0 : index
    %c0_32 = arith.constant 0 : index
    %c0_33 = arith.constant 0 : index
    %68 = vector.load %arg4[%c0_31, %c0_32, %c0_33] : memref<1x8x384xbf16, #tpu.memory_space<vmem>>, vector<1x8x384xbf16>
    %69 = vector.shape_cast %68 : vector<1x8x384xbf16> to vector<8x384xbf16>
    %70 = vector.shape_cast %67 : vector<8x384xbf16> to vector<1x8x384xbf16>
    tpu.vector_store %arg4[%c0_31, %c0_32, %c0_33], %70 {strides = array<i32>} : memref<1x8x384xbf16, #tpu.memory_space<vmem>>, vector<1x8x384xbf16>,
    return
  }
  func.func @transform_0(%arg0: i32) -> (i32, i32, i32) {
    %c0_i32 = arith.constant 0 : i32
    %c0_i32_0 = arith.constant 0 : i32
    %c0_i32_1 = arith.constant 0 : i32
    return %arg0, %c0_i32, %c0_i32_0 : i32, i32, i32
  }
  func.func @transform_1(%arg0: i32) -> (i32, i32) {
    %c0_i32 = arith.constant 0 : i32
    %c0_i32_0 = arith.constant 0 : i32
    %c0_i32_1 = arith.constant 0 : i32
    return %c0_i32, %c0_i32_0 : i32, i32
  }
  func.func @transform_2(%arg0: i32) -> (i32, i32, i32) {
    %c0_i32 = arith.constant 0 : i32
    %c0_i32_0 = arith.constant 0 : i32
    %c0_i32_1 = arith.constant 0 : i32
    %c0_i32_2 = arith.constant 0 : i32
    return %c0_i32, %c0_i32_0, %c0_i32_1 : i32, i32, i32
  }
  func.func @transform_3(%arg0: i32) -> (i32, i32, i32) {
    %c0_i32 = arith.constant 0 : i32
    %c0_i32_0 = arith.constant 0 : i32
    %c0_i32_1 = arith.constant 0 : i32
    return %arg0, %c0_i32, %c0_i32_0 : i32, i32, i32
  }
  func.func @transform_4(%arg0: i32) -> (i32, i32, i32) {
    %c0_i32 = arith.constant 0 : i32
    %c0_i32_0 = arith.constant 0 : i32
    %c0_i32_1 = arith.constant 0 : i32
    return %arg0, %c0_i32, %c0_i32_0 : i32, i32, i32
  }
}

module attributes {stable_mosaic.version = 11 : i64} {
  func.func @_bn_relu_kernel(%arg0: i32, %arg1: memref<1x8x256xf32, #tpu.memory_space<vmem>>, %arg2: memref<8x1xf32, #tpu.memory_space<vmem>>, %arg3: memref<8x1xf32, #tpu.memory_space<vmem>>, %arg4: memref<1x8x256xf32, #tpu.memory_space<vmem>>) attributes {dimension_semantics = [#tpu.dimension_semantics<parallel>], iteration_bounds = array<i64: 2>, scalar_prefetch = 0 : i64, scratch_operands = 0 : i64, tpu.core_type = #tpu.core_type<tc>, window_params = [{transform_indices = @transform_0, window_bounds = array<i64: 1, 8, 256>}, {pipeline_mode = #tpu.pipeline_mode<synchronous>, transform_indices = @transform_1, window_bounds = array<i64: 8, 1>}, {pipeline_mode = #tpu.pipeline_mode<synchronous>, transform_indices = @transform_2, window_bounds = array<i64: 8, 1>}, {transform_indices = @transform_3, window_bounds = array<i64: 1, 8, 256>}]} {
    %c0 = arith.constant 0 : index
    %c0_0 = arith.constant 0 : index
    %c0_1 = arith.constant 0 : index
    %0 = vector.load %arg1[%c0, %c0_0, %c0_1] : memref<1x8x256xf32, #tpu.memory_space<vmem>>, vector<1x8x256xf32>
    %1 = vector.shape_cast %0 : vector<1x8x256xf32> to vector<8x256xf32>
    %c0_2 = arith.constant 0 : index
    %c0_3 = arith.constant 0 : index
    %2 = vector.load %arg2[%c0_2, %c0_3] : memref<8x1xf32, #tpu.memory_space<vmem>>, vector<8x1xf32>
    %3 = vector.broadcast %2 : vector<8x1xf32> to vector<8x256xf32>
    %4 = arith.mulf %1, %3 : vector<8x256xf32>
    %c0_4 = arith.constant 0 : index
    %c0_5 = arith.constant 0 : index
    %5 = vector.load %arg3[%c0_4, %c0_5] : memref<8x1xf32, #tpu.memory_space<vmem>>, vector<8x1xf32>
    %6 = vector.broadcast %5 : vector<8x1xf32> to vector<8x256xf32>
    %7 = arith.addf %4, %6 : vector<8x256xf32>
    %cst = arith.constant 0.000000e+00 : f32
    %8 = vector.broadcast %cst : f32 to vector<8x256xf32>
    %9 = arith.maximumf %7, %8 : vector<8x256xf32>
    %c0_6 = arith.constant 0 : index
    %c0_7 = arith.constant 0 : index
    %c0_8 = arith.constant 0 : index
    %10 = vector.load %arg4[%c0_6, %c0_7, %c0_8] : memref<1x8x256xf32, #tpu.memory_space<vmem>>, vector<1x8x256xf32>
    %11 = vector.shape_cast %10 : vector<1x8x256xf32> to vector<8x256xf32>
    %12 = vector.shape_cast %9 : vector<8x256xf32> to vector<1x8x256xf32>
    tpu.vector_store %arg4[%c0_6, %c0_7, %c0_8], %12 {strides = array<i32>} : memref<1x8x256xf32, #tpu.memory_space<vmem>>, vector<1x8x256xf32>,
    return
  }
  func.func @transform_0(%arg0: i32) -> (i32, i32, i32) {
    %c0_i32 = arith.constant 0 : i32
    %c0_i32_0 = arith.constant 0 : i32
    %c0_i32_1 = arith.constant 0 : i32
    return %arg0, %c0_i32, %c0_i32_0 : i32, i32, i32
  }
  func.func @transform_1(%arg0: i32) -> (i32, i32) {
    %c0_i32 = arith.constant 0 : i32
    %c0_i32_0 = arith.constant 0 : i32
    %c0_i32_1 = arith.constant 0 : i32
    return %c0_i32, %c0_i32_0 : i32, i32
  }
  func.func @transform_2(%arg0: i32) -> (i32, i32) {
    %c0_i32 = arith.constant 0 : i32
    %c0_i32_0 = arith.constant 0 : i32
    %c0_i32_1 = arith.constant 0 : i32
    return %c0_i32, %c0_i32_0 : i32, i32
  }
  func.func @transform_3(%arg0: i32) -> (i32, i32, i32) {
    %c0_i32 = arith.constant 0 : i32
    %c0_i32_0 = arith.constant 0 : i32
    %c0_i32_1 = arith.constant 0 : i32
    return %arg0, %c0_i32, %c0_i32_0 : i32, i32, i32
  }
}

module attributes {stable_mosaic.version = 11 : i64} {
  func.func @_conv3x3_kernel(%arg0: i32, %arg1: memref<1x8x384xbf16, #tpu.memory_space<vmem>>, %arg2: memref<8x72xbf16, #tpu.memory_space<vmem>>, %arg3: memref<9x1x256xf32, #tpu.memory_space<vmem>>, %arg4: memref<8x1xf32, #tpu.memory_space<vmem>>, %arg5: memref<8x1xf32, #tpu.memory_space<vmem>>, %arg6: memref<1x8x256xf32, #tpu.memory_space<vmem>>, %arg7: memref<1x8x2xf32, #tpu.memory_space<vmem>>) attributes {dimension_semantics = [#tpu.dimension_semantics<parallel>], iteration_bounds = array<i64: 2>, scalar_prefetch = 0 : i64, scratch_operands = 0 : i64, tpu.core_type = #tpu.core_type<tc>, window_params = [{transform_indices = @transform_0, window_bounds = array<i64: 1, 8, 384>}, {pipeline_mode = #tpu.pipeline_mode<synchronous>, transform_indices = @transform_1, window_bounds = array<i64: 8, 72>}, {pipeline_mode = #tpu.pipeline_mode<synchronous>, transform_indices = @transform_2, window_bounds = array<i64: 9, 1, 256>}, {pipeline_mode = #tpu.pipeline_mode<synchronous>, transform_indices = @transform_3, window_bounds = array<i64: 8, 1>}, {pipeline_mode = #tpu.pipeline_mode<synchronous>, transform_indices = @transform_4, window_bounds = array<i64: 8, 1>}, {transform_indices = @transform_5, window_bounds = array<i64: 1, 8, 256>}, {transform_indices = @transform_6, window_bounds = array<i64: 1, 8, 2>}]} {
    %c0 = arith.constant 0 : index
    %c0_0 = arith.constant 0 : index
    %c0_1 = arith.constant 0 : index
    %0 = vector.load %arg1[%c0, %c0_0, %c0_1] : memref<1x8x384xbf16, #tpu.memory_space<vmem>>, vector<1x8x384xbf16>
    %1 = vector.shape_cast %0 : vector<1x8x384xbf16> to vector<8x384xbf16>
    %2 = arith.extf %1 : vector<8x384xbf16> to vector<8x384xf32>
    %c0_2 = arith.constant 0 : index
    %c0_3 = arith.constant 0 : index
    %3 = vector.load %arg4[%c0_2, %c0_3] : memref<8x1xf32, #tpu.memory_space<vmem>>, vector<8x1xf32>
    %4 = vector.broadcast %3 : vector<8x1xf32> to vector<8x384xf32>
    %5 = arith.mulf %2, %4 : vector<8x384xf32>
    %c0_4 = arith.constant 0 : index
    %c0_5 = arith.constant 0 : index
    %6 = vector.load %arg5[%c0_4, %c0_5] : memref<8x1xf32, #tpu.memory_space<vmem>>, vector<8x1xf32>
    %7 = vector.broadcast %6 : vector<8x1xf32> to vector<8x384xf32>
    %8 = arith.addf %5, %7 : vector<8x384xf32>
    %cst = arith.constant 0.000000e+00 : f32
    %9 = vector.broadcast %cst : f32 to vector<8x384xf32>
    %10 = arith.maximumf %8, %9 : vector<8x384xf32>
    %11 = vector.extract_strided_slice %10 {offsets = [0, 0], sizes = [8, 256], strides = [1, 1]} : vector<8x384xf32> to vector<8x256xf32>
    %c0_6 = arith.constant 0 : index
    %c0_7 = arith.constant 0 : index
    %c0_8 = arith.constant 0 : index
    %12 = vector.load %arg3[%c0_6, %c0_7, %c0_8] : memref<9x1x256xf32, #tpu.memory_space<vmem>>, vector<1x1x256xf32>
    %13 = vector.shape_cast %12 : vector<1x1x256xf32> to vector<1x256xf32>
    %14 = vector.broadcast %13 : vector<1x256xf32> to vector<8x256xf32>
    %15 = arith.mulf %11, %14 : vector<8x256xf32>
    %16 = vector.extract_strided_slice %10 {offsets = [0, 1], sizes = [8, 256], strides = [1, 1]} : vector<8x384xf32> to vector<8x256xf32>
    %c1 = arith.constant 1 : index
    %c0_9 = arith.constant 0 : index
    %c0_10 = arith.constant 0 : index
    %17 = vector.load %arg3[%c1, %c0_9, %c0_10] : memref<9x1x256xf32, #tpu.memory_space<vmem>>, vector<1x1x256xf32>
    %18 = vector.shape_cast %17 : vector<1x1x256xf32> to vector<1x256xf32>
    %19 = vector.broadcast %18 : vector<1x256xf32> to vector<8x256xf32>
    %20 = arith.mulf %16, %19 : vector<8x256xf32>
    %21 = vector.extract_strided_slice %10 {offsets = [0, 2], sizes = [8, 256], strides = [1, 1]} : vector<8x384xf32> to vector<8x256xf32>
    %c2 = arith.constant 2 : index
    %c0_11 = arith.constant 0 : index
    %c0_12 = arith.constant 0 : index
    %22 = vector.load %arg3[%c2, %c0_11, %c0_12] : memref<9x1x256xf32, #tpu.memory_space<vmem>>, vector<1x1x256xf32>
    %23 = vector.shape_cast %22 : vector<1x1x256xf32> to vector<1x256xf32>
    %24 = vector.broadcast %23 : vector<1x256xf32> to vector<8x256xf32>
    %25 = arith.mulf %21, %24 : vector<8x256xf32>
    %26 = vector.extract_strided_slice %10 {offsets = [0, 16], sizes = [8, 256], strides = [1, 1]} : vector<8x384xf32> to vector<8x256xf32>
    %c3 = arith.constant 3 : index
    %c0_13 = arith.constant 0 : index
    %c0_14 = arith.constant 0 : index
    %27 = vector.load %arg3[%c3, %c0_13, %c0_14] : memref<9x1x256xf32, #tpu.memory_space<vmem>>, vector<1x1x256xf32>
    %28 = vector.shape_cast %27 : vector<1x1x256xf32> to vector<1x256xf32>
    %29 = vector.broadcast %28 : vector<1x256xf32> to vector<8x256xf32>
    %30 = arith.mulf %26, %29 : vector<8x256xf32>
    %31 = vector.extract_strided_slice %10 {offsets = [0, 17], sizes = [8, 256], strides = [1, 1]} : vector<8x384xf32> to vector<8x256xf32>
    %c4 = arith.constant 4 : index
    %c0_15 = arith.constant 0 : index
    %c0_16 = arith.constant 0 : index
    %32 = vector.load %arg3[%c4, %c0_15, %c0_16] : memref<9x1x256xf32, #tpu.memory_space<vmem>>, vector<1x1x256xf32>
    %33 = vector.shape_cast %32 : vector<1x1x256xf32> to vector<1x256xf32>
    %34 = vector.broadcast %33 : vector<1x256xf32> to vector<8x256xf32>
    %35 = arith.mulf %31, %34 : vector<8x256xf32>
    %36 = vector.extract_strided_slice %10 {offsets = [0, 18], sizes = [8, 256], strides = [1, 1]} : vector<8x384xf32> to vector<8x256xf32>
    %c5 = arith.constant 5 : index
    %c0_17 = arith.constant 0 : index
    %c0_18 = arith.constant 0 : index
    %37 = vector.load %arg3[%c5, %c0_17, %c0_18] : memref<9x1x256xf32, #tpu.memory_space<vmem>>, vector<1x1x256xf32>
    %38 = vector.shape_cast %37 : vector<1x1x256xf32> to vector<1x256xf32>
    %39 = vector.broadcast %38 : vector<1x256xf32> to vector<8x256xf32>
    %40 = arith.mulf %36, %39 : vector<8x256xf32>
    %41 = vector.extract_strided_slice %10 {offsets = [0, 32], sizes = [8, 256], strides = [1, 1]} : vector<8x384xf32> to vector<8x256xf32>
    %c6 = arith.constant 6 : index
    %c0_19 = arith.constant 0 : index
    %c0_20 = arith.constant 0 : index
    %42 = vector.load %arg3[%c6, %c0_19, %c0_20] : memref<9x1x256xf32, #tpu.memory_space<vmem>>, vector<1x1x256xf32>
    %43 = vector.shape_cast %42 : vector<1x1x256xf32> to vector<1x256xf32>
    %44 = vector.broadcast %43 : vector<1x256xf32> to vector<8x256xf32>
    %45 = arith.mulf %41, %44 : vector<8x256xf32>
    %46 = vector.extract_strided_slice %10 {offsets = [0, 33], sizes = [8, 256], strides = [1, 1]} : vector<8x384xf32> to vector<8x256xf32>
    %c7 = arith.constant 7 : index
    %c0_21 = arith.constant 0 : index
    %c0_22 = arith.constant 0 : index
    %47 = vector.load %arg3[%c7, %c0_21, %c0_22] : memref<9x1x256xf32, #tpu.memory_space<vmem>>, vector<1x1x256xf32>
    %48 = vector.shape_cast %47 : vector<1x1x256xf32> to vector<1x256xf32>
    %49 = vector.broadcast %48 : vector<1x256xf32> to vector<8x256xf32>
    %50 = arith.mulf %46, %49 : vector<8x256xf32>
    %51 = vector.extract_strided_slice %10 {offsets = [0, 34], sizes = [8, 256], strides = [1, 1]} : vector<8x384xf32> to vector<8x256xf32>
    %c8 = arith.constant 8 : index
    %c0_23 = arith.constant 0 : index
    %c0_24 = arith.constant 0 : index
    %52 = vector.load %arg3[%c8, %c0_23, %c0_24] : memref<9x1x256xf32, #tpu.memory_space<vmem>>, vector<1x1x256xf32>
    %53 = vector.shape_cast %52 : vector<1x1x256xf32> to vector<1x256xf32>
    %54 = vector.broadcast %53 : vector<1x256xf32> to vector<8x256xf32>
    %55 = arith.mulf %51, %54 : vector<8x256xf32>
    %56 = tpu.concatenate %15, %20, %25, %30, %35, %40, %45, %50, %55 in 0 : vector<8x256xf32>, vector<8x256xf32>, vector<8x256xf32>, vector<8x256xf32>, vector<8x256xf32>, vector<8x256xf32>, vector<8x256xf32>, vector<8x256xf32>, vector<8x256xf32> -> vector<72x256xf32>
    %57 = arith.truncf %56 : vector<72x256xf32> to vector<72x256xbf16>
    %c0_25 = arith.constant 0 : index
    %c0_26 = arith.constant 0 : index
    %58 = vector.load %arg2[%c0_25, %c0_26] : memref<8x72xbf16, #tpu.memory_space<vmem>>, vector<8x72xbf16>
    %cst_27 = arith.constant dense<0.000000e+00> : vector<8x256xf32>
    %59 = tpu.matmul %58, %57, %cst_27 {dimension_numbers = #tpu.dot_dimension_numbers<[1], [0], [0], [1], [0, 0, 1, 1], [], []>} : vector<8x72xbf16>, vector<72x256xbf16>, vector<8x256xf32> -> vector<8x256xf32>
    %cst_28 = arith.constant dense<0.000000e+00> : vector<8xf32>
    %60 = vector.multi_reduction <add>, %59, %cst_28 [1] : vector<8x256xf32> to vector<8xf32>
    %61 = vector.shape_cast %60 : vector<8xf32> to vector<8x1xf32>
    %cst_29 = arith.constant 3.906250e-03 : f32
    %62 = vector.broadcast %cst_29 : f32 to vector<8x1xf32>
    %63 = arith.mulf %61, %62 : vector<8x1xf32>
    %64 = vector.broadcast %63 : vector<8x1xf32> to vector<8x256xf32>
    %65 = arith.subf %59, %64 : vector<8x256xf32>
    %66 = arith.mulf %65, %65 : vector<8x256xf32>
    %cst_30 = arith.constant dense<0.000000e+00> : vector<8xf32>
    %67 = vector.multi_reduction <add>, %66, %cst_30 [1] : vector<8x256xf32> to vector<8xf32>
    %68 = vector.shape_cast %67 : vector<8xf32> to vector<8x1xf32>
    %69 = tpu.concatenate %61, %68 in 1 : vector<8x1xf32>, vector<8x1xf32> -> vector<8x2xf32>
    %c0_31 = arith.constant 0 : index
    %c0_32 = arith.constant 0 : index
    %c0_33 = arith.constant 0 : index
    %70 = vector.load %arg7[%c0_31, %c0_32, %c0_33] : memref<1x8x2xf32, #tpu.memory_space<vmem>>, vector<1x8x2xf32>
    %71 = vector.shape_cast %70 : vector<1x8x2xf32> to vector<8x2xf32>
    %72 = vector.shape_cast %69 : vector<8x2xf32> to vector<1x8x2xf32>
    tpu.vector_store %arg7[%c0_31, %c0_32, %c0_33], %72 {strides = array<i32>} : memref<1x8x2xf32, #tpu.memory_space<vmem>>, vector<1x8x2xf32>,
    %c0_34 = arith.constant 0 : index
    %c0_35 = arith.constant 0 : index
    %c0_36 = arith.constant 0 : index
    %73 = vector.load %arg6[%c0_34, %c0_35, %c0_36] : memref<1x8x256xf32, #tpu.memory_space<vmem>>, vector<1x8x256xf32>
    %74 = vector.shape_cast %73 : vector<1x8x256xf32> to vector<8x256xf32>
    %75 = vector.shape_cast %59 : vector<8x256xf32> to vector<1x8x256xf32>
    tpu.vector_store %arg6[%c0_34, %c0_35, %c0_36], %75 {strides = array<i32>} : memref<1x8x256xf32, #tpu.memory_space<vmem>>, vector<1x8x256xf32>,
    return
  }
  func.func @transform_0(%arg0: i32) -> (i32, i32, i32) {
    %c0_i32 = arith.constant 0 : i32
    %c0_i32_0 = arith.constant 0 : i32
    %c0_i32_1 = arith.constant 0 : i32
    return %arg0, %c0_i32, %c0_i32_0 : i32, i32, i32
  }
  func.func @transform_1(%arg0: i32) -> (i32, i32) {
    %c0_i32 = arith.constant 0 : i32
    %c0_i32_0 = arith.constant 0 : i32
    %c0_i32_1 = arith.constant 0 : i32
    return %c0_i32, %c0_i32_0 : i32, i32
  }
  func.func @transform_2(%arg0: i32) -> (i32, i32, i32) {
    %c0_i32 = arith.constant 0 : i32
    %c0_i32_0 = arith.constant 0 : i32
    %c0_i32_1 = arith.constant 0 : i32
    %c0_i32_2 = arith.constant 0 : i32
    return %c0_i32, %c0_i32_0, %c0_i32_1 : i32, i32, i32
  }
  func.func @transform_3(%arg0: i32) -> (i32, i32) {
    %c0_i32 = arith.constant 0 : i32
    %c0_i32_0 = arith.constant 0 : i32
    %c0_i32_1 = arith.constant 0 : i32
    return %c0_i32, %c0_i32_0 : i32, i32
  }
  func.func @transform_4(%arg0: i32) -> (i32, i32) {
    %c0_i32 = arith.constant 0 : i32
    %c0_i32_0 = arith.constant 0 : i32
    %c0_i32_1 = arith.constant 0 : i32
    return %c0_i32, %c0_i32_0 : i32, i32
  }
  func.func @transform_5(%arg0: i32) -> (i32, i32, i32) {
    %c0_i32 = arith.constant 0 : i32
    %c0_i32_0 = arith.constant 0 : i32
    %c0_i32_1 = arith.constant 0 : i32
    return %arg0, %c0_i32, %c0_i32_0 : i32, i32, i32
  }
  func.func @transform_6(%arg0: i32) -> (i32, i32, i32) {
    %c0_i32 = arith.constant 0 : i32
    %c0_i32_0 = arith.constant 0 : i32
    %c0_i32_1 = arith.constant 0 : i32
    return %arg0, %c0_i32, %c0_i32_0 : i32, i32, i32
  }
}

</mosaic_0001>

<bundles_post_ra>
// kernel: double_conv_forward.5
= control target key start
LH: loop header
LB: loop body
LE: loop exit
PB: predicated region body
PF: predicated region fallthrough
CT: control target
= control target key end

     0   :  { %s300_s12 = smov 0   ;;  %s323_s0 = inlined_call_operand.vmem [shape: f32[2,8,256], index: 0, kind: input, shape index: {}]   ;;  %s324_s1 = inlined_call_operand.vmem [shape: f32[8,1], index: 1, kind: input, shape index: {}]   ;;  %s325_s2 = inlined_call_operand.vmem [shape: f32[8,1], index: 2, kind: input, shape index: {}]   ;;  %s326_s3 = inlined_call_operand.vmem [shape: f32[2,8,256], index: 3, kind: output, shape index: {}]  }
   0x1 LB: > { %s248_s13 = sadd.s32 4294967295, %s277_s12   ;;  %p252_p0 = scmp.ge.s32.totalorder %s277_s12, 1  ;;  %s277_s12 = sphi %s300_s12, %s13_s12  }
   0x2   : > { %p137_p1 = scmp.lt.s32.totalorder %s277_s12, 3 }
   0x4   : > { %p138_p2 = pnand %p252_p0, %p137_p1 }
   0x5   : > { %v173_v0 = vld [vmem:[%s324_s1] sm:$0xff] (!%p138_p2)  ;;  %v279_v1 = vmov (!%p138_p2), 0   ;;  %p161_p3 = scmp.lt.s32.totalorder (!%p138_p2), %s248_s13, 1 }
   0x6   : > { %141 = sbr.rel (%p138_p2) target bundleno = 144 (0x90), region = 32  ;;  %270 = vset.pattern.permute.xlu0 (!%p138_p2), %v279_v1  ;;  %v181_v2 = vld [vmem:[%s325_s2] sm:$0xff] (!%p138_p2) }
   0x7   : > { %176 = vperm.xlu0 (!%p138_p2), %270, %v173_v0  }
   0xb   : > { %184 = vperm.xlu0 (!%p138_p2), %270, %v181_v2  }
   0xd   : > { %s328_s13 = smov (!%p161_p3, %s248_s13), 1 }
   0xe   : > { %s259_s18 = sshll.u32 %s328_s13, 4 }
   0xf   : > { %s165_s21 = scalar_lea.vmem %s323_s0, %s259_s18  ;;  %s170_s24 = scalar_lea.vmem %s326_s3, %s259_s18 }
  0x10   : > { %v171_v4 = vld [vmem:[%s165_s21] sm:$0xff]  ;;  %v172_v5 = vld [vmem:[%s165_s21 + $0x8] sm:$0xff] }
  0x86   : > { %v177_v3 = vpop.permute.xlu0 %176 }
  0x87   : > { %v179_v6 = vmul.f32 %v177_v3, %v171_v4  ;;  %v180_v7 = vmul.f32 %v177_v3, %v172_v5 }
  0x8a   : > { %v185_v8 = vpop.permute.xlu0 %184 }
  0x8b   : > { %v187_v9 = vadd.f32 %v185_v8, %v179_v6  ;;  %v188_v10 = vadd.f32 %v185_v8, %v180_v7 }
  0x8d   : > { %v189_v11 = vmax.f32 %v187_v9, 0.0  ;;  %v190_v12 = vmax.f32 %v188_v10, 0.0 }
  0x8f   : > { %191 = vst [vmem:[%s170_s24] sm:$0xff] %v189_v11  ;;  %192 = vst [vmem:[%s170_s24 + $0x8] sm:$0xff] %v190_v12 }
  0x90 PF: > { %s13_s12 = sadd.s32 1, %s277_s12  }
  0x91   : > { %p10_p4 = scmp.ge.s32.totalorder %s13_s12, 4  }
  0x93   :  { %12 = sbr.rel (!%p10_p4) target bundleno = 1 (0x1), region = 62 }

// kernel: double_conv_forward.4
= control target key start
LH: loop header
LB: loop body
LE: loop exit
PB: predicated region body
PF: predicated region fallthrough
CT: control target
= control target key end

     0   :  { %s913_s21 = smov 0   ;;  %s1042_s0 = inlined_call_operand.vmem [shape: bf16[2,8,384], index: 0, kind: input, shape index: {}]   ;;  %s1043_s1 = inlined_call_operand.vmem [shape: bf16[8,72], index: 1, kind: input, shape index: {}]   ;;  %s1044_s2 = inlined_call_operand.vmem [shape: f32[9,1,256], index: 2, kind: input, shape index: {}]   ;;  %s1045_s3 = inlined_call_operand.vmem [shape: f32[8,1], index: 3, kind: input, shape index: {}]   ;;  %s1046_s4 = inlined_call_operand.vmem [shape: f32[8,1], index: 4, kind: input, shape index: {}]   ;;  %s1047_s5 = inlined_call_operand.vmem [shape: f32[2,8,256], index: 5, kind: output, shape index: {0}]   ;;  %s1048_s6 = inlined_call_operand.vmem [shape: f32[2,8,2], index: 6, kind: output, shape index: {1}]  }
   0x1 LB: > { %s764_s22 = sadd.s32 4294967295, %s859_s21   ;;  %p768_p0 = scmp.ge.s32.totalorder %s859_s21, 1  ;;  %s859_s21 = sphi %s913_s21, %s17_s21  }
   0x2   : > { %p215_p1 = scmp.lt.s32.totalorder %s859_s21, 3 }
   0x4   : > { %p216_p2 = pnand %p768_p0, %p215_p1 }
   0x5   : > { %v269_v0 = vld [vmem:[%s1045_s3] sm:$0xff] (!%p216_p2)  ;;  %v292_v1 = vlaneseq (!%p216_p2)  ;;  %v861_v2 = vmov (!%p216_p2), 0   ;;  %s862_s7 = smov (!%p216_p2), 1   ;;  %s863_s10 = smov (!%p216_p2), 2   ;;  %v776_v15 = vld [vmem:[%s1044_s2 + $0x8] sm:$0x3] (!%p216_p2) }
   0x6   : > { %219 = sbr.rel (%p216_p2) target bundleno = 808 (0x328), region = 40  ;;  %812 = vset.pattern.permute.xlu0 (!%p216_p2), %v861_v2  ;;  %654 = vmatprep.mubr.bf16.mxu0 (!%p216_p2), %v861_v2  ;;  %v278_v4 = vld [vmem:[%s1046_s4] sm:$0xff] (!%p216_p2)  ;;  %s864_s13 = smov (!%p216_p2), 16   ;;  %v777_v18 = vld [vmem:[%s1044_s2 + $0xa] sm:$0x3] (!%p216_p2)  ;;  %vm319_vm0 = vcmask (!%p216_p2), 7168  }
   0x7   : > { %272 = vperm.xlu0 (!%p216_p2), %812, %v269_v0   ;;  %v293_v3 = vshrl.u32 (!%p216_p2), %v292_v1, 7  ;;  %v773_v5 = vld [vmem:[%s1044_s2 + $0x2] sm:$0x3] (!%p216_p2)  ;;  %v774_v9 = vld [vmem:[%s1044_s2 + $0x4] sm:$0x3] (!%p216_p2)  ;;  %s865_s16 = smov (!%p216_p2), 17  }
   0x8   : > { %v775_v12 = vld [vmem:[%s1044_s2 + $0x6] sm:$0x3] (!%p216_p2)  ;;  %v778_v21 = vld [vmem:[%s1044_s2 + $0xc] sm:$0x3] (!%p216_p2)  ;;  %s866_s19 = smov (!%p216_p2), 18   ;;  %s867_s24 = smov (!%p216_p2), 32  }
   0x9   : > { %v930_v6 = vsub.s32 (!%p216_p2), 0, %v293_v3  ;;  %v932_v7 = vsub.s32 (!%p216_p2), 1, %v293_v3  ;;  %v779_v24 = vld [vmem:[%s1044_s2 + $0xe] sm:$0x3] (!%p216_p2)  ;;  %v780_v27 = vld [vmem:[%s1044_s2 + $0x10] sm:$0x3] (!%p216_p2) }
   0xa   : > { %s868_s27 = smov (!%p216_p2), 33   ;;  %s869_s28 = smov (!%p216_p2), 34   ;;  %v290_v43 = vld [vmem:[%s1044_s2] sm:$0x3] (!%p216_p2)  ;;  %vm342_vm1 = vcmask (!%p216_p2), 15360   ;;  %vm365_vm2 = vcmask (!%p216_p2), 130048  }
   0xb   : > { %281 = vperm.xlu0 (!%p216_p2), %812, %v278_v4   ;;  %v310_v8 = vrot.slane (!%p216_p2), %v773_v5, %v930_v6  ;;  %v333_v10 = vrot.slane (!%p216_p2), %v774_v9, %v930_v6  ;;  %v314_v11 = vrot.slane (!%p216_p2), %v773_v5, %v932_v7  ;;  %v356_v13 = vrot.slane (!%p216_p2), %v775_v12, %v930_v6  ;;  %p249_p3 = scmp.lt.s32.totalorder (!%p216_p2), %s764_s22, 1  ;;  %s870_s11 = smov (!%p216_p2), 127  }
   0xc   : > { %v337_v14 = vrot.slane (!%p216_p2), %v774_v9, %v932_v7  ;;  %v379_v16 = vrot.slane (!%p216_p2), %v776_v15, %v930_v6  ;;  %v360_v17 = vrot.slane (!%p216_p2), %v775_v12, %v932_v7  ;;  %v402_v19 = vrot.slane (!%p216_p2), %v777_v18, %v930_v6  ;;  %s871_s12 = smov (!%p216_p2), 126   ;;  %s873_s14 = smov (!%p216_p2), 111  }
   0xd   : > { %315 = vrot.lane.b32.xlu1 %v310_v8, %s862_s7  ;;  %v383_v20 = vrot.slane %v776_v15, %v932_v7  ;;  %v425_v22 = vrot.slane %v778_v21, %v930_v6  ;;  %v406_v23 = vrot.slane %v777_v18, %v932_v7  ;;  %v448_v25 = vrot.slane %v779_v24, %v930_v6  ;;  %s1050_s22 = smov (!%p249_p3, %s764_s22), 1  ;;  %s874_s15 = smov 110  }
   0xe   : > { %v429_v26 = vrot.slane %v778_v21, %v932_v7  ;;  %v471_v28 = vrot.slane %v780_v27, %v930_v6  ;;  %v452_v29 = vrot.slane %v779_v24, %v932_v7  ;;  %v475_v30 = vrot.slane %v780_v27, %v932_v7  ;;  %s786_s29 = smul.u32 12, %s1050_s22  ;;  %s876_s17 = smov 95  }
   0xf   : > { %338 = vrot.lane.b32.xlu0 %v333_v10, %s863_s10  ;;  %v299_v49 = vrot.slane %v290_v43, %v932_v7  ;;  %v295_v53 = vrot.slane %v290_v43, %v930_v6  ;;  %vm388_vm3 = vcmask 138240   ;;  %vm411_vm4 = vcmask 146432   ;;  %s877_s18 = smov 94   ;;  %s785_s23 = sshll.u32 %s1050_s22, 4 }
  0x10   : > { %s253_s8 = scalar_lea.vmem %s1042_s0, %s786_s29  ;;  %vm434_vm5 = vcmask 261120   ;;  %vm457_vm6 = vcmask 269312   ;;  %vm480_vm7 = vcmask 277504   ;;  %vm497_vm8 = vcmask 1039360   ;;  %s258_s26 = scalar_lea.vmem %s1047_s5, %s785_s23 }
  0x11   : > { %317 = vrot.lane.b32.xlu1 %v314_v11, %s862_s7  ;;  %v264_v32 = vld [vmem:[%s253_s8] sm:$0xff]  ;;  %v265_v33 = vld [vmem:[%s253_s8 + $0x8] sm:$0xf]  ;;  %vm511_vm9 = vcmask 1031168   ;;  %vm525_vm10 = vcmask 916480   ;;  %vm539_vm11 = vcmask 908288  }
  0x12   : > { %v266_v35 = vunpack.c.l.bf16 %v264_v32  ;;  %v267_v36 = vunpack.c.h.bf16 %v264_v32  ;;  %v268_v37 = vunpack.c.l.bf16 %v265_v33  ;;  %vm553_vm12 = vcmask 900096  }
  0x13   : > { %361 = vrot.lane.b32.xlu0 %v356_v13, %s864_s13  ;;  %vm567_vm13 = vcmask 785408   ;;  %vm581_vm14 = vcmask 777216   ;;  %vm595_vm15 = vcmask 769024  }
  0x15   : > { %340 = vrot.lane.b32.xlu1 %v337_v14, %s863_s10 }
  0x17   : > { %384 = vrot.lane.b32.xlu0 %v379_v16, %s865_s16 }
  0x19   : > { %363 = vrot.lane.b32.xlu1 %v360_v17, %s864_s13  ;;  %s872_s13 = smov 112  }
  0x1b   : > { %407 = vrot.lane.b32.xlu0 %v402_v19, %s866_s19 }
  0x1d   : > { %386 = vrot.lane.b32.xlu1 %v383_v20, %s865_s16  ;;  %s875_s16 = smov 96  }
  0x1f   : > { %430 = vrot.lane.b32.xlu0 %v425_v22, %s867_s24 }
  0x21   : > { %409 = vrot.lane.b32.xlu1 %v406_v23, %s866_s19 }
  0x23   : > { %453 = vrot.lane.b32.xlu0 %v448_v25, %s868_s27 }
  0x25   : > { %432 = vrot.lane.b32.xlu1 %v429_v26, %s867_s24 }
  0x27   : > { %476 = vrot.lane.b32.xlu0 %v471_v28, %s869_s28 }
  0x29   : > { %455 = vrot.lane.b32.xlu1 %v452_v29, %s868_s27  ;;  %s772_s27 = sshll.u32 %s1050_s22, 3 }
  0x2a   : > { %s262_s30 = scalar_lea.vmem %s1048_s6, %s772_s27 }
  0x2d   : > { %478 = vrot.lane.b32.xlu1 %v475_v30, %s869_s28 }
  0x7f   : > { %v316_v31 = vpop.permute.xlu1 %315 }
  0x83   : > { %v318_v34 = vpop.permute.xlu1 %317 }
  0x84   : > { %v320_v55 = vsel %vm319_vm0, %v316_v31, %v318_v34 }
  0x86   : > { %v273_v38 = vpop.permute.xlu0 %272 }
  0x87   : > { %v341_v39 = vpop.permute.xlu1 %340  ;;  %v275_v40 = vmul.f32 %v273_v38, %v266_v35  ;;  %v276_v41 = vmul.f32 %v273_v38, %v267_v36  ;;  %v277_v42 = vmul.f32 %v273_v38, %v268_v37 }
  0x8a   : > { %v282_v44 = vpop.permute.xlu0 %281 }
  0x8b   : > { %v284_v45 = vadd.f32 %v282_v44, %v275_v40  ;;  %v285_v46 = vadd.f32 %v282_v44, %v276_v41  ;;  %v286_v47 = vadd.f32 %v282_v44, %v277_v42  ;;  %v364_v48 = vpop.permute.xlu1 %363 }
  0x8d   : > { %v985_v50 = vmax.f32 %v284_v45, 0.0  ;;  %v987_v51 = vmax.f32 %v285_v46, 0.0  ;;  %v989_v52 = vmax.f32 %v286_v47, 0.0 }
  0x8e   : > { %v339_v54 = vpop.permute.xlu0 %338 }
  0x8f   : > { %v343_v56 = vsel %vm342_vm1, %v339_v54, %v341_v39  ;;  %v387_v57 = vpop.permute.xlu1 %386  ;;  %v324_v58 = vmul.f32 %v316_v31, %v985_v50  ;;  %v325_v59 = vmul.f32 %v320_v55, %v987_v51  ;;  %v326_v60 = vmul.f32 %v318_v34, %v989_v52 }
  0x90   : > { %v998_v61 = vmul.f32 %v299_v49, %v987_v51  ;;  %v1001_v62 = vmul.f32 %v295_v53, %v985_v50  ;;  %v348_v63 = vmul.f32 %v343_v56, %v987_v51  ;;  %v349_v2 = vmul.f32 %v341_v39, %v989_v52 }
  0x91   : > { %491 = vrot.lane.b32.xlu1 %v324_v58, %s870_s11  ;;  %v813_v1 = vpack.i.bf16 %v326_v60, %v325_v59  ;;  %v372_v4 = vmul.f32 %v364_v48, %v989_v52  ;;  %v347_v11 = vmul.f32 %v339_v54, %v985_v50  ;;  %v395_v17 = vmul.f32 %v387_v57, %v989_v52 }
  0x92   : > { %v362_v0 = vpop.permute.xlu0 %361  ;;  %v818_v8 = vpack.i.bf16 %v349_v2, %v348_v63 }
  0x93   : > { %v366_v3 = vsel %vm365_vm2, %v362_v0, %v364_v48  ;;  %v410_v6 = vpop.permute.xlu1 %409  ;;  %814 = vrot.lane.b32.xlu0 %v813_v1, %s870_s11  ;;  %v370_v12 = vmul.f32 %v362_v0, %v985_v50  ;;  %vm615_vm2 = vcmask 1043456  }
  0x94   : > { %v371_v5 = vmul.f32 %v366_v3, %v987_v51  ;;  %v418_v18 = vmul.f32 %v410_v6, %v989_v52 }
  0x96   : > { %v385_v7 = vpop.permute.xlu0 %384  ;;  %v823_v9 = vpack.i.bf16 %v372_v4, %v371_v5 }
  0x97   : > { %v389_v10 = vsel %vm388_vm3, %v385_v7, %v387_v57  ;;  %819 = vrot.lane.b32.xlu0 %v818_v8, %s871_s12  ;;  %v433_v14 = vpop.permute.xlu1 %432  ;;  %v393_v25 = vmul.f32 %v385_v7, %v985_v50  ;;  %vm611_vm3 = vcmask 588800  }
  0x98   : > { %824 = vrot.lane.b32.xlu1 %v823_v9, %s872_s13  ;;  %v394_v13 = vmul.f32 %v389_v10, %v987_v51  ;;  %v441_v30 = vmul.f32 %v433_v14, %v989_v52 }
  0x9a   : > { %v408_v15 = vpop.permute.xlu0 %407  ;;  %v828_v21 = vpack.i.bf16 %v395_v17, %v394_v13 }
  0x9b   : > { %v412_v16 = vsel %vm411_vm4, %v408_v15, %v410_v6  ;;  %505 = vrot.lane.b32.xlu0 %v347_v11, %s871_s12  ;;  %v456_v24 = vpop.permute.xlu1 %455  ;;  %v416_v26 = vmul.f32 %v408_v15, %v985_v50 }
  0x9c   : > { %v417_v19 = vmul.f32 %v412_v16, %v987_v51  ;;  %519 = vrot.lane.b32.xlu1 %v370_v12, %s872_s13  ;;  %v464_v31 = vmul.f32 %v456_v24, %v989_v52 }
  0x9e   : > { %v431_v20 = vpop.permute.xlu0 %430  ;;  %v833_v22 = vpack.i.bf16 %v418_v18, %v417_v19 }
  0x9f   : > { %v435_v23 = vsel %vm434_vm5, %v431_v20, %v433_v14  ;;  %829 = vrot.lane.b32.xlu0 %v828_v21, %s873_s14  ;;  %v479_v33 = vpop.permute.xlu1 %478  ;;  %v439_v38 = vmul.f32 %v431_v20, %v985_v50 }
  0xa0   : > { %834 = vrot.lane.b32.xlu1 %v833_v22, %s874_s15  ;;  %v440_v27 = vmul.f32 %v435_v23, %v987_v51  ;;  %v487_v42 = vmul.f32 %v479_v33, %v989_v52 }
  0xa2   : > { %v454_v28 = vpop.permute.xlu0 %453  ;;  %v838_v35 = vpack.i.bf16 %v441_v30, %v440_v27 }
  0xa3   : > { %v458_v29 = vsel %vm457_vm6, %v454_v28, %v456_v24  ;;  %533 = vrot.lane.b32.xlu0 %v393_v25, %s873_s14  ;;  %v462_v39 = vmul.f32 %v454_v28, %v985_v50 }
  0xa4   : > { %v463_v32 = vmul.f32 %v458_v29, %v987_v51  ;;  %547 = vrot.lane.b32.xlu1 %v416_v26, %s874_s15 }
  0xa6   : > { %v477_v34 = vpop.permute.xlu0 %476  ;;  %v843_v36 = vpack.i.bf16 %v464_v31, %v463_v32 }
  0xa7   : > { %v481_v37 = vsel %vm480_vm7, %v477_v34, %v479_v33  ;;  %839 = vrot.lane.b32.xlu0 %v838_v35, %s875_s16  ;;  %v485_v40 = vmul.f32 %v477_v34, %v985_v50 }
  0xa8   : > { %844 = vrot.lane.b32.xlu1 %v843_v36, %s876_s17  ;;  %v486_v41 = vmul.f32 %v481_v37, %v987_v51 }
  0xaa   : > { %v848_v43 = vpack.i.bf16 %v486_v41, %v485_v40 }
  0xab   : > { %561 = vrot.lane.b32.xlu0 %v439_v38, %s875_s16 }
  0xac   : > { %575 = vrot.lane.b32.xlu1 %v462_v39, %s876_s17  ;;  %v610_v39 = vld [vmem:[%s1043_s1] sm:$0xf] }
  0xaf   : > { %849 = vrot.lane.b32.xlu0 %v848_v43, %s877_s18 }
  0xb0   : > { %593 = vrot.lane.b32.xlu1 %v487_v42, %s877_s18 }
 0x103   : > { %v492_v44 = vpop.permute.xlu1 %491 }
 0x105   : > { %v815_v45 = vpop.permute.xlu0 %814 }
 0x106   : > { %v817_v46 = vunpack.i.h.bf16 %v815_v45  ;;  %v816_v47 = vunpack.i.l.bf16 %v815_v45 }
 0x108   : > { %v499_v48 = vsel %vm497_vm8, %v816_v47, %v817_v46  ;;  %v498_v49 = vsel %vm497_vm8, %v492_v44, %v816_v47 }
 0x109   : > { %v820_v53 = vpop.permute.xlu0 %819  ;;  %v601_v50 = vpack.c.bf16 %v499_v48, %v998_v61  ;;  %v600_v51 = vpack.c.bf16 %v498_v49, %v1001_v62 }
 0x10a   : > { %v825_v54 = vpop.permute.xlu1 %824  ;;  %v822_v52 = vunpack.i.h.bf16 %v820_v53  ;;  %v821_v55 = vunpack.i.l.bf16 %v820_v53 }
 0x10b   : > { %v827_v56 = vunpack.i.h.bf16 %v825_v54  ;;  %v826_v57 = vunpack.i.l.bf16 %v825_v54  ;;  %622 = vmatprep.subr.bf16.mxu0 %v601_v50 }
 0x10c   : > { %623 = vmatpush1.bf16.msra.mxu0 %v600_v51  ;;  %v513_v58 = vsel %vm511_vm9, %v821_v55, %v822_v52 }
 0x10d   : > { %v527_v59 = vsel %vm525_vm10, %v826_v57, %v827_v56  ;;  %v506_v60 = vpop.permute.xlu0 %505 }
 0x10e   : > { %v520_v63 = vpop.permute.xlu1 %519  ;;  %v603_v0 = vpack.c.bf16 %v527_v59, %v513_v58  ;;  %v512_v1 = vsel %vm511_vm9, %v506_v60, %v821_v55 }
 0x10f   : > { %v526_v2 = vsel %vm525_vm10, %v520_v63, %v826_v57 }
 0x110   : > { %v602_v3 = vpack.c.bf16 %v526_v2, %v512_v1  ;;  %624 = vmatprep.subr.bf16.mxu0 %v603_v0 }
 0x111   : > { %v830_v61 = vpop.permute.xlu0 %829 }
 0x112   : > { %v835_v4 = vpop.permute.xlu1 %834  ;;  %625 = vmatpush1.bf16.msra.mxu0 %v602_v3  ;;  %v832_v62 = vunpack.i.h.bf16 %v830_v61  ;;  %v831_v5 = vunpack.i.l.bf16 %v830_v61 }
 0x113   : > { %v837_v6 = vunpack.i.h.bf16 %v835_v4  ;;  %v836_v7 = vunpack.i.l.bf16 %v835_v4 }
 0x114   : > { %v541_v8 = vsel %vm539_vm11, %v831_v5, %v832_v62 }
 0x115   : > { %v555_v9 = vsel %vm553_vm12, %v836_v7, %v837_v6  ;;  %v534_v10 = vpop.permute.xlu0 %533 }
 0x116   : > { %v548_v11 = vpop.permute.xlu1 %547  ;;  %v605_v12 = vpack.c.bf16 %v555_v9, %v541_v8  ;;  %v540_v13 = vsel %vm539_vm11, %v534_v10, %v831_v5 }
 0x117   : > { %v554_v14 = vsel %vm553_vm12, %v548_v11, %v836_v7 }
 0x118   : > { %v604_v15 = vpack.c.bf16 %v554_v14, %v540_v13  ;;  %626 = vmatprep.subr.bf16.mxu0 %v605_v12 }
 0x119   : > { %v840_v16 = vpop.permute.xlu0 %839 }
 0x11a   : > { %v845_v17 = vpop.permute.xlu1 %844  ;;  %627 = vmatpush1.bf16.msra.mxu0 %v604_v15  ;;  %v842_v18 = vunpack.i.h.bf16 %v840_v16  ;;  %v841_v19 = vunpack.i.l.bf16 %v840_v16 }
 0x11b   : > { %v847_v20 = vunpack.i.h.bf16 %v845_v17  ;;  %v846_v21 = vunpack.i.l.bf16 %v845_v17 }
 0x11c   : > { %v569_v22 = vsel %vm567_vm13, %v841_v19, %v842_v18 }
 0x11d   : > { %v583_v23 = vsel %vm581_vm14, %v846_v21, %v847_v20  ;;  %v562_v24 = vpop.permute.xlu0 %561 }
 0x11e   : > { %v576_v25 = vpop.permute.xlu1 %575  ;;  %v607_v26 = vpack.c.bf16 %v583_v23, %v569_v22  ;;  %v568_v27 = vsel %vm567_vm13, %v562_v24, %v841_v19 }
 0x11f   : > { %v582_v28 = vsel %vm581_vm14, %v576_v25, %v846_v21 }
 0x120   : > { %v606_v29 = vpack.c.bf16 %v582_v28, %v568_v27  ;;  %628 = vmatprep.subr.bf16.mxu0 %v607_v26 }
 0x121   : > { %v850_v30 = vpop.permute.xlu0 %849 }
 0x122   : > { %v594_v31 = vpop.permute.xlu1 %593  ;;  %629 = vmatpush1.bf16.msra.mxu0 %v606_v29  ;;  %v852_v32 = vunpack.i.h.bf16 %v850_v30  ;;  %v851_v33 = vunpack.i.l.bf16 %v850_v30 }
 0x124   : > { %v597_v34 = vsel %vm595_vm15, %v852_v32, %v594_v31  ;;  %v596_v35 = vsel %vm595_vm15, %v851_v33, %v852_v32 }
 0x125   : > { %v609_v36 = vpack.c.bf16 %v597_v34, %v597_v34  ;;  %v608_v37 = vpack.c.bf16 %v596_v35, %v596_v35 }
 0x127   : > { %781 = vmatprep.subr.msk.bf16.mxu0 %vm615_vm2, %v609_v36  ;;  %v617_v38 = vsel %vm615_vm2, %v608_v37, 0 }
 0x128   : > { %631 = vmatpush1.bf16.msra.mxu0 %v617_v38 }
 0x12b   : > { %782 = vmatmul.mubr.msk.bf16.vlgmr.msra.gmra.mrb[0].mxu0 %vm611_vm3, %v610_v39 }
 0x1fe   : > { %v656_v40 = vpop.f32.mrb[0].mxu0 }
 0x1ff   : > { %676 = vst [vmem:[%s258_s26] sm:$0xff] %v656_v40  ;;  %v658_v41 = vpop.f32.mrb[1].mxu0 }
 0x200   : > { %677 = vst [vmem:[%s258_s26 + $0x8] sm:$0xff] %v658_v41  ;;  %v660_v42 = vpop.f32.mrb[2].mxu0  ;;  %v663_v43 = vadd.f32 %v658_v41, %v656_v40 }
 0x201   : > { %v661_v44 = vpop.f32.mrb[3].mxu0 }
 0x202   : > { %664 = vadd.xlane.f32.xlu0 %v663_v43 }
 0x28f   : > { %v665_v45 = vpop.xlane.xlu0 %664 }
 0x290   : > { %v666_v46 = vmul.f32 0.00390625, %v665_v45 }
 0x292   : > { %v667_v47 = vsub.f32 %v656_v40, %v666_v46  ;;  %v668_v48 = vsub.f32 %v658_v41, %v666_v46 }
 0x294   : > { %v669_v49 = vmul.f32 %v667_v47, %v667_v47  ;;  %v670_v53 = vmul.f32 %v668_v48, %v668_v48 }
 0x296   : > { %v671_v54 = vadd.f32 %v670_v53, %v669_v49 }
 0x298   : > { %672 = vadd.xlane.f32.xlu1 %v671_v54 }
 0x325   : > { %v673_v50 = vpop.xlane.xlu1 %672 }
 0x326   : > { %v674_v51 = vsel %vm319_vm0, %v665_v45, %v673_v50 }
 0x327   : > { %675 = vst.msk [vmem:[%s262_s30] sm:$0xff] %vm342_vm1, %v674_v51 }
 0x328 PF: > { %s17_s21 = sadd.s32 1, %s859_s21  }
 0x329   : > { %p14_p4 = scmp.ge.s32.totalorder %s17_s21, 4  }
 0x32b   :  { %16 = sbr.rel (!%p14_p4) target bundleno = 1 (0x1), region = 90 }

// kernel: double_conv_forward.3
= control target key start
LH: loop header
LB: loop body
LE: loop exit
PB: predicated region body
PF: predicated region fallthrough
CT: control target
= control target key end

     0   :  { %s851_s15 = smov 0   ;;  %s1013_s0 = inlined_call_operand.vmem [shape: f32[2,4,384], index: 0, kind: input, shape index: {}]   ;;  %s1014_s1 = inlined_call_operand.vmem [shape: bf16[8,36], index: 1, kind: input, shape index: {}]   ;;  %s1015_s2 = inlined_call_operand.vmem [shape: f32[9,1,256], index: 2, kind: input, shape index: {}]   ;;  %s1016_s3 = inlined_call_operand.vmem [shape: bf16[2,8,384], index: 3, kind: output, shape index: {0}]   ;;  %s1017_s4 = inlined_call_operand.vmem [shape: f32[2,8,2], index: 4, kind: output, shape index: {1}]  }
   0x1 LB: > { %s706_s16 = sadd.s32 4294967295, %s807_s15   ;;  %p710_p0 = scmp.ge.s32.totalorder %s807_s15, 1  ;;  %s807_s15 = sphi %s851_s15, %s15_s15  }
   0x2   : > { %p165_p1 = scmp.lt.s32.totalorder %s807_s15, 3 }
   0x4   : > { %p166_p2 = pnand %p710_p0, %p165_p1 }
   0x5   : > { %v214_v0 = vlaneseq (!%p166_p2)  ;;  %v716_v2 = vld [vmem:[%s1015_s2 + $0x6] sm:$0x3] (!%p166_p2)  ;;  %v715_v3 = vld [vmem:[%s1015_s2 + $0x4] sm:$0x3] (!%p166_p2)  ;;  %v717_v6 = vld [vmem:[%s1015_s2 + $0x8] sm:$0x3] (!%p166_p2) }
   0x6   : > { %169 = sbr.rel (%p166_p2) target bundleno = 805 (0x325), region = 32  ;;  %v714_v7 = vld [vmem:[%s1015_s2 + $0x2] sm:$0x3] (!%p166_p2)  ;;  %v718_v12 = vld [vmem:[%s1015_s2 + $0xa] sm:$0x3] (!%p166_p2)  ;;  %s809_s29 = smov (!%p166_p2), 16  }
   0x7   : > { %v215_v1 = vshrl.u32 (!%p166_p2), %v214_v0, 7  ;;  %v719_v17 = vld [vmem:[%s1015_s2 + $0xc] sm:$0x3] (!%p166_p2)  ;;  %s810_s30 = smov (!%p166_p2), 2   ;;  %v720_v26 = vld [vmem:[%s1015_s2 + $0xe] sm:$0x3] (!%p166_p2) }
   0x8   : > { %v721_v27 = vld [vmem:[%s1015_s2 + $0x10] sm:$0x3] (!%p166_p2)  ;;  %s811_s9 = smov (!%p166_p2), 17   ;;  %s812_s10 = smov (!%p166_p2), 1   ;;  %vm261_vm0 = vcmask (!%p166_p2), 15360   ;;  %vm303_vm1 = vcmask (!%p166_p2), 138240  }
   0x9   : > { %v865_v4 = vsub.s32 (!%p166_p2), 0, %v215_v1  ;;  %v867_v5 = vsub.s32 (!%p166_p2), 1, %v215_v1  ;;  %s813_s11 = smov (!%p166_p2), 18   ;;  %s814_s12 = smov (!%p166_p2), 32   ;;  %vm240_vm2 = vcmask (!%p166_p2), 7168   ;;  %vm282_vm3 = vcmask (!%p166_p2), 130048  }
   0xa   : > { %s815_s13 = smov (!%p166_p2), 33   ;;  %s816_s14 = smov (!%p166_p2), 34   ;;  %vm324_vm4 = vcmask (!%p166_p2), 146432   ;;  %vm345_vm5 = vcmask (!%p166_p2), 261120   ;;  %vm366_vm6 = vcmask (!%p166_p2), 269312   ;;  %vm387_vm7 = vcmask (!%p166_p2), 277504  }
   0xb   : > { %v273_v8 = vrot.slane (!%p166_p2), %v716_v2, %v865_v4  ;;  %v277_v9 = vrot.slane (!%p166_p2), %v716_v2, %v867_v5  ;;  %v252_v10 = vrot.slane (!%p166_p2), %v715_v3, %v865_v4  ;;  %v256_v11 = vrot.slane (!%p166_p2), %v715_v3, %v867_v5  ;;  %p195_p3 = scmp.lt.s32.totalorder (!%p166_p2), %s706_s16, 1  ;;  %s817_s21 = smov (!%p166_p2), 126  }
   0xc   : > { %v294_v13 = vrot.slane (!%p166_p2), %v717_v6, %v865_v4  ;;  %v298_v14 = vrot.slane (!%p166_p2), %v717_v6, %v867_v5  ;;  %v231_v15 = vrot.slane (!%p166_p2), %v714_v7, %v865_v4  ;;  %v235_v16 = vrot.slane (!%p166_p2), %v714_v7, %v867_v5  ;;  %s818_s22 = smov (!%p166_p2), 111   ;;  %s819_s23 = smov (!%p166_p2), 127  }
   0xd   : > { %v278_v18 = vcombine.low %v273_v8, %v277_v9  ;;  %v257_v19 = vcombine.low %v252_v10, %v256_v11  ;;  %v315_v21 = vrot.slane %v718_v12, %v865_v4  ;;  %v319_v22 = vrot.slane %v718_v12, %v867_v5  ;;  %s1019_s16 = smov (!%p195_p3, %s706_s16), 1  ;;  %s820_s24 = smov 110  }
   0xe   : > { %v299_v20 = vcombine.low %v294_v13, %v298_v14  ;;  %v236_v23 = vcombine.low %v231_v15, %v235_v16  ;;  %v336_v24 = vrot.slane %v719_v17, %v865_v4  ;;  %v340_v25 = vrot.slane %v719_v17, %v867_v5  ;;  %s730_s17 = smul.u32 12, %s1019_s16  ;;  %s821_s25 = smov 112  }
   0xf   : > { %279 = vrot.lane.b32.xlu1 %v278_v18, %s809_s29  ;;  %258 = vrot.lane.b32.xlu0 %v257_v19, %s810_s30  ;;  %v320_v28 = vcombine.low %v315_v21, %v319_v22  ;;  %v357_v29 = vrot.slane %v720_v26, %v865_v4  ;;  %v361_v30 = vrot.slane %v720_v26, %v867_v5  ;;  %s822_s26 = smov 95   ;;  %s823_s27 = smov 96   ;;  %vm406_vm8 = vcmask 1039360  }
  0x10   : > { %v341_v31 = vcombine.low %v336_v24, %v340_v25  ;;  %v378_v32 = vrot.slane %v721_v27, %v865_v4  ;;  %v382_v33 = vrot.slane %v721_v27, %v867_v5  ;;  %s199_s20 = scalar_lea.vmem %s1013_s0, %s730_s17  ;;  %s824_s28 = smov 94   ;;  %vm420_vm9 = vcmask 1031168  }
  0x11   : > { %v362_v34 = vcombine.low %v357_v29, %v361_v30  ;;  %v918_v38 = vld [vmem:[%s199_s20] sm:$0xff]  ;;  %v928_v45 = vld [vmem:[%s199_s20 + $0x8] sm:$0xf]  ;;  %vm435_vm10 = vcmask 916480   ;;  %vm512_vm11 = vcmask 1043456   ;;  %vm478_vm12 = vcmask 785408  }
  0x12   : > { %v383_v35 = vcombine.low %v378_v32, %v382_v33  ;;  %vm493_vm13 = vcmask 777216   ;;  %vm449_vm14 = vcmask 908288   ;;  %vm464_vm15 = vcmask 900096  }
  0x13   : > { %300 = vrot.lane.b32.xlu1 %v299_v20, %s811_s9  ;;  %237 = vrot.lane.b32.xlu0 %v236_v23, %s812_s10  ;;  %s204_s10 = scalar_lea.vmem %s1016_s3, %s730_s17 }
  0x17   : > { %321 = vrot.lane.b32.xlu1 %v320_v28, %s813_s11  ;;  %342 = vrot.lane.b32.xlu0 %v341_v31, %s814_s12 }
  0x1b   : > { %363 = vrot.lane.b32.xlu0 %v362_v34, %s815_s13  ;;  %384 = vrot.lane.b32.xlu1 %v383_v35, %s816_s14  ;;  %v825_v34 = vmov 0  }
  0x1c   : > { %571 = vmatprep.mubr.bf16.mxu0 %v825_v34 }
  0x81   : > { %v280_v36 = vpop.permute.xlu1 %279  ;;  %v916_v37 = vpop.permute.xlu0 %258 }
  0x82   : > { %v260_v39 = vrot.slane %v916_v37, 4  ;;  %v281_v41 = vrot.slane %v280_v36, 4 }
  0x84   : > { %v262_v40 = vsel %vm261_vm0, %v260_v39, %v916_v37  ;;  %v287_v51 = vmul.f32 %v281_v41, %v928_v45  ;;  %v283_v56 = vsel %vm282_vm3, %v281_v41, %v280_v36  ;;  %v266_v24 = vmul.f32 %v260_v39, %v928_v45  ;;  %v212_v39 = vld [vmem:[%s1015_s2] sm:$0x3] }
  0x85   : > { %v926_v42 = vmul.f32 %v262_v40, %v918_v38  ;;  %v301_v43 = vpop.permute.xlu1 %300  ;;  %v238_v44 = vpop.permute.xlu0 %237  ;;  %v286_v62 = vmul.f32 %v283_v56, %v918_v38  ;;  %v217_v41 = vrot.slane %v212_v39, %v865_v4  ;;  %vm507_vm3 = vcmask 769024  }
  0x86   : > { %v302_v46 = vrot.slane %v301_v43, 4  ;;  %v239_v47 = vrot.slane %v238_v44, 4  ;;  %v428_v63 = vcombine.low %v287_v51, %v287_v51 }
  0x87   : > { %414 = vrot.lane.b32.xlu0 %v926_v42, %s817_s21  ;;  %v413_v19 = vcombine.high %v926_v42, %v926_v42  ;;  %v427_v32 = vcombine.low %v286_v62, %v286_v62  ;;  %v221_v42 = vrot.slane %v212_v39, %v867_v5 }
  0x88   : > { %v304_v48 = vsel %vm303_vm1, %v302_v46, %v301_v43  ;;  %v241_v49 = vsel %vm240_vm2, %v239_v47, %v238_v44  ;;  %v245_v50 = vmul.f32 %v239_v47, %v928_v45  ;;  %v761_v16 = vpack.i.bf16 %v428_v63, %v286_v62 }
  0x89   : > { %v307_v52 = vmul.f32 %v304_v48, %v918_v38  ;;  %v244_v53 = vmul.f32 %v241_v49, %v918_v38  ;;  %v322_v54 = vpop.permute.xlu1 %321  ;;  %v343_v55 = vpop.permute.xlu0 %342  ;;  %v308_v18 = vmul.f32 %v302_v46, %v928_v45  ;;  %v776_v27 = vpack.i.bf16 %v266_v24, %v413_v19 }
  0x8a   : > { %v399_v57 = vcombine.low %v245_v50, %v245_v50  ;;  %v323_v58 = vrot.slane %v322_v54, 4  ;;  %v344_v59 = vrot.slane %v343_v55, 4  ;;  %v222_v44 = vcombine.low %v217_v41, %v221_v42 }
  0x8b   : > { %443 = vrot.lane.b32.xlu0 %v307_v52, %s818_s22  ;;  %v442_v13 = vcombine.high %v307_v52, %v307_v52  ;;  %v398_v30 = vcombine.low %v244_v53, %v244_v53 }
  0x8c   : > { %v325_v60 = vsel %vm324_vm4, %v323_v58, %v322_v54  ;;  %v329_v61 = vmul.f32 %v323_v58, %v928_v45  ;;  %v756_v2 = vpack.i.bf16 %v399_v57, %v244_v53  ;;  %v346_v7 = vsel %vm345_vm5, %v344_v59, %v343_v55 }
  0x8d   : > { %v328_v0 = vmul.f32 %v325_v60, %v918_v38  ;;  %v364_v1 = vpop.permute.xlu0 %363  ;;  %v385_v3 = vpop.permute.xlu1 %384  ;;  %v349_v14 = vmul.f32 %v346_v7, %v918_v38  ;;  %v781_v23 = vpack.i.bf16 %v308_v18, %v442_v13  ;;  %v350_v25 = vmul.f32 %v344_v59, %v928_v45 }
  0x8e   : > { %v457_v6 = vcombine.low %v329_v61, %v329_v61  ;;  %v365_v8 = vrot.slane %v364_v1, 4  ;;  %v386_v12 = vrot.slane %v385_v3, 4  ;;  %v224_v48 = vmul.f32 %v222_v44, %v918_v38 }
  0x8f   : > { %757 = vrot.lane.b32.xlu0 %v756_v2, %s819_s23  ;;  %v471_v22 = vcombine.high %v349_v14, %v349_v14  ;;  %v456_v33 = vcombine.low %v328_v0, %v328_v0  ;;  %vm532_vm4 = vcmask 1041408   ;;  %vm528_vm5 = vcmask 293888  }
  0x90   : > { %v367_v9 = vsel %vm366_vm6, %v365_v8, %v364_v1  ;;  %v371_v10 = vmul.f32 %v365_v8, %v928_v45  ;;  %v766_v11 = vpack.i.bf16 %v457_v6, %v328_v0  ;;  %v388_v21 = vsel %vm387_vm7, %v386_v12, %v385_v3 }
  0x91   : > { %v370_v15 = vmul.f32 %v367_v9, %v918_v38  ;;  %v391_v26 = vmul.f32 %v388_v21, %v918_v38  ;;  %v786_v28 = vpack.i.bf16 %v350_v25, %v471_v22  ;;  %v392_v36 = vmul.f32 %v386_v12, %v928_v45 }
  0x92   : > { %v486_v17 = vcombine.low %v371_v10, %v371_v10  ;;  %767 = vrot.lane.b32.xlu1 %v766_v11, %s820_s24  ;;  %v394_v54 = vcombine.high %v224_v48, %v224_v48 }
  0x93   : > { %762 = vrot.lane.b32.xlu0 %v761_v16, %s821_s25  ;;  %v500_v29 = vcombine.high %v391_v26, %v391_v26  ;;  %v485_v35 = vcombine.low %v370_v15, %v370_v15 }
  0x94   : > { %v771_v20 = vpack.i.bf16 %v486_v17, %v370_v15 }
  0x95   : > { %v791_v31 = vpack.i.bf16 %v500_v29, %v391_v26 }
  0x96   : > { %772 = vrot.lane.b32.xlu1 %v771_v20, %s822_s26 }
  0x97   : > { %782 = vrot.lane.b32.xlu0 %v781_v23, %s818_s22 }
  0x9a   : > { %777 = vrot.lane.b32.xlu1 %v776_v27, %s817_s21 }
  0x9b   : > { %787 = vrot.lane.b32.xlu0 %v786_v28, %s823_s27 }
  0x9e   : > { %400 = vrot.lane.b32.xlu1 %v398_v30, %s819_s23 }
  0x9f   : > { %472 = vrot.lane.b32.xlu0 %v349_v14, %s823_s27 }
  0xa2   : > { %429 = vrot.lane.b32.xlu1 %v427_v32, %s821_s25 }
  0xa3   : > { %792 = vrot.lane.b32.xlu0 %v791_v31, %s824_s28 }
  0xa6   : > { %458 = vrot.lane.b32.xlu1 %v456_v33, %s820_s24 }
  0xaa   : > { %487 = vrot.lane.b32.xlu1 %v485_v35, %s822_s26 }
  0xae   : > { %505 = vrot.lane.b32.xlu1 %v392_v36, %s824_s28 }
  0xf9   : > { %v415_v37 = vpop.permute.xlu0 %414 }
  0xfd   : > { %v964_v40 = vpop.permute.xlu0 %443 }
 0x101   : > { %v758_v43 = vpop.permute.xlu0 %757 }
 0x102   : > { %v760_v49 = vunpack.i.h.bf16 %v758_v43  ;;  %v759_v45 = vunpack.i.l.bf16 %v758_v43 }
 0x104   : > { %v768_v46 = vpop.permute.xlu1 %767  ;;  %v408_v56 = vsel %vm406_vm8, %v759_v45, %v760_v49 }
 0x105   : > { %v763_v47 = vpop.permute.xlu0 %762  ;;  %v514_v62 = vsel %vm512_vm11, %v394_v54, %v408_v56  ;;  %v770_v7 = vunpack.i.h.bf16 %v768_v46  ;;  %v769_v8 = vunpack.i.l.bf16 %v768_v46 }
 0x106   : > { %v765_v52 = vunpack.i.h.bf16 %v763_v47  ;;  %v764_v53 = vunpack.i.l.bf16 %v763_v47 }
 0x107   : > { %v466_v18 = vsel %vm464_vm15, %v769_v8, %v770_v7 }
 0x108   : > { %v773_v50 = vpop.permute.xlu1 %772  ;;  %v437_v61 = vsel %vm435_vm10, %v764_v53, %v765_v52 }
 0x109   : > { %v783_v51 = vpop.permute.xlu0 %782  ;;  %v775_v38 = vunpack.i.h.bf16 %v773_v50  ;;  %v774_v63 = vunpack.i.l.bf16 %v773_v50 }
 0x10a   : > { %v785_v0 = vunpack.i.h.bf16 %v783_v51  ;;  %v784_v1 = vunpack.i.l.bf16 %v783_v51 }
 0x10b   : > { %v495_v12 = vsel %vm493_vm13, %v774_v63, %v775_v38 }
 0x10c   : > { %v778_v55 = vpop.permute.xlu1 %777  ;;  %v451_v13 = vsel %vm449_vm14, %v784_v1, %v785_v0  ;;  %v450_v31 = vsel %vm449_vm14, %v964_v40, %v784_v1  ;;  %v527_v40 = vld [vmem:[%s1014_s1] sm:$0xf] }
 0x10d   : > { %v780_v4 = vunpack.i.h.bf16 %v778_v55  ;;  %v779_v5 = vunpack.i.l.bf16 %v778_v55  ;;  %v788_v57 = vpop.permute.xlu0 %787  ;;  %v518_v23 = vsel %vm512_vm11, %v451_v13, %v466_v18 }
 0x10e   : > { %v790_v58 = vunpack.i.h.bf16 %v788_v57  ;;  %v789_v59 = vunpack.i.l.bf16 %v788_v57 }
 0x10f   : > { %v422_v60 = vsel %vm420_vm9, %v779_v5, %v780_v4  ;;  %v421_v16 = vsel %vm420_vm9, %v415_v37, %v779_v5 }
 0x110   : > { %v401_v2 = vpop.permute.xlu1 %400  ;;  %v516_v3 = vsel %vm512_vm11, %v422_v60, %v437_v61  ;;  %v480_v10 = vsel %vm478_vm12, %v789_v59, %v790_v58 }
 0x111   : > { %v522_v6 = vpack.c.bf16 %v516_v3, %v514_v62  ;;  %v473_v9 = vpop.permute.xlu0 %472  ;;  %v407_v11 = vsel %vm406_vm8, %v401_v2, %v759_v45  ;;  %v520_v17 = vsel %vm512_vm11, %v480_v10, %v495_v12 }
 0x112   : > { %v513_v19 = vsel %vm512_vm11, %v224_v48, %v407_v11  ;;  %v524_v25 = vpack.c.bf16 %v520_v17, %v518_v23  ;;  %v479_v30 = vsel %vm478_vm12, %v473_v9, %v789_v59 }
 0x113   : > { %539 = vmatprep.subr.bf16.mxu0 %v522_v6 }
 0x114   : > { %v430_v14 = vpop.permute.xlu1 %429 }
 0x115   : > { %v436_v15 = vsel %vm435_vm10, %v430_v14, %v764_v53  ;;  %v793_v21 = vpop.permute.xlu0 %792 }
 0x116   : > { %v515_v20 = vsel %vm512_vm11, %v421_v16, %v436_v15  ;;  %v795_v26 = vunpack.i.h.bf16 %v793_v21  ;;  %v794_v27 = vunpack.i.l.bf16 %v793_v21 }
 0x117   : > { %v521_v22 = vpack.c.bf16 %v515_v20, %v513_v19 }
 0x118   : > { %v459_v24 = vpop.permute.xlu1 %458  ;;  %v508_v33 = vsel %vm507_vm3, %v794_v27, %v795_v26 }
 0x119   : > { %540 = vmatpush1.bf16.msra.mxu0 %v521_v22  ;;  %v465_v28 = vsel %vm464_vm15, %v459_v24, %v769_v8  ;;  %v525_v39 = vpack.c.bf16 %v508_v33, %v508_v33 }
 0x11a   : > { %541 = vmatprep.subr.bf16.mxu0 %v524_v25  ;;  %v517_v34 = vsel %vm512_vm11, %v450_v31, %v465_v28 }
 0x11b   : > { %v534_v43 = vsel %vm532_vm4, %v525_v39, 0 }
 0x11c   : > { %v488_v29 = vpop.permute.xlu1 %487 }
 0x11d   : > { %v494_v32 = vsel %vm493_vm13, %v488_v29, %v774_v63 }
 0x11e   : > { %v519_v35 = vsel %vm512_vm11, %v479_v30, %v494_v32 }
 0x11f   : > { %v523_v36 = vpack.c.bf16 %v519_v35, %v517_v34 }
 0x120   : > { %v506_v37 = vpop.permute.xlu1 %505 }
 0x121   : > { %v509_v41 = vsel %vm507_vm3, %v795_v26, %v506_v37  ;;  %542 = vmatpush1.bf16.msra.mxu0 %v523_v36 }
 0x122   : > { %v526_v42 = vpack.c.bf16 %v509_v41, %v509_v41 }
 0x124   : > { %722 = vmatprep.subr.msk.bf16.mxu0 %vm532_vm4, %v526_v42 }
 0x125   : > { %544 = vmatpush1.bf16.msra.mxu0 %v534_v43 }
 0x128   : > { %723 = vmatmul.mubr.msk.bf16.vlgmr.msra.gmra.mrb[0].mxu0 %vm528_vm5, %v527_v40 }
 0x1fb   : > { %v573_v44 = vpop.f32.mrb[0].mxu0 }
 0x1fc   : > { %v575_v46 = vpop.f32.mrb[1].mxu0 }
 0x1fd   : > { %v796_v47 = vpack.i.bf16 %v575_v46, %v573_v44  ;;  %v577_v48 = vpop.f32.mrb[2].mxu0  ;;  %v580_v49 = vadd.f32 %v575_v46, %v573_v44 }
 0x1fe   : > { %v578_v45 = vpop.f32.mrb[3].mxu0 }
 0x1ff   : > { %581 = vadd.xlane.f32.xlu0 %v580_v49 }
 0x215   : > { %797 = vrot.lane.b32.xlu0 %v796_v47, %s811_s9  ;;  %s713_s9 = sshll.u32 %s1019_s16, 3 }
 0x216   : > { %s208_s13 = scalar_lea.vmem %s1017_s4, %s713_s9 }
 0x28c   : > { %v582_v50 = vpop.xlane.xlu0 %581 }
 0x28d   : > { %v583_v51 = vmul.f32 0.00390625, %v582_v50 }
 0x28f   : > { %v584_v52 = vsub.f32 %v573_v44, %v583_v51  ;;  %v585_v53 = vsub.f32 %v575_v46, %v583_v51 }
 0x290   : > { %v798_v54 = vpop.permute.xlu0 %797 }
 0x291   : > { %v800_v55 = vunpack.i.h.bf16 %v798_v54  ;;  %v799_v56 = vunpack.i.l.bf16 %v798_v54  ;;  %v586_v4 = vmul.f32 %v584_v52, %v584_v52  ;;  %v587_v5 = vmul.f32 %v585_v53, %v585_v53 }
 0x293   : > { %v604_v57 = vsel %vm303_vm1, %v800_v55, 0.0  ;;  %v599_v58 = vsel %vm303_vm1, %v799_v56, %v800_v55  ;;  %v603_v59 = vsel %vm303_vm1, 0.0, %v799_v56  ;;  %v588_v38 = vadd.f32 %v587_v5, %v586_v4 }
 0x294   : > { %v729_v60 = vpack.c.bf16 %v604_v57, %v604_v57  ;;  %v728_v61 = vpack.c.bf16 %v599_v58, %v603_v59 }
 0x295   : > { %589 = vadd.xlane.f32.xlu1 %v588_v38 }
 0x296   : > { %619 = vst [vmem:[%s204_s10 + $0x8] sm:$0xf] %v729_v60  ;;  %618 = vst [vmem:[%s204_s10] sm:$0xff] %v728_v61 }
 0x322   : > { %v590_v62 = vpop.xlane.xlu1 %589 }
 0x323   : > { %v591_v63 = vsel %vm240_vm2, %v582_v50, %v590_v62 }
 0x324   : > { %592 = vst.msk [vmem:[%s208_s13] sm:$0xff] %vm261_vm0, %v591_v63 }
 0x325 PF: > { %s15_s15 = sadd.s32 1, %s807_s15  }
 0x326   : > { %p12_p4 = scmp.ge.s32.totalorder %s15_s15, 4  }
 0x328   :  { %14 = sbr.rel (!%p12_p4) target bundleno = 1 (0x1), region = 82 }

</bundles_post_ra>
